<compile_context>
chip_gen: v7x
topology: tpu7x:2x2x1
jax: 0.10.0
libtpu: 0.0.40
codegen_flags: <defaults>
</compile_context>

<pallas_src>
import jax
import jax.numpy as jnp
from jax.experimental import pallas as pl
from jax.experimental.pallas import tpu as pltpu


def _round_up(x, m):
    return ((x + m - 1) // m) * m


def sdgcn_kernel(ctx_ref, adj_ref, posw_ref, mrow_ref, valid_ref,
                 w1_ref, b1_ref, w2_ref, b2_ref, pooled_ref):
    TB, S, D = ctx_ref.shape
    ctx = ctx_ref[...]                     # [TB, S, D] f32
    adjm = adj_ref[...]                    # [TB, S, S] f32
    wpos = posw_ref[...]                   # [TB, S, 1] f32
    mrow = mrow_ref[...]                   # [TB, 1, S] f32 (aspect mask, lane-dense)
    valid = valid_ref[...]                 # [1,  S, 1] f32 (1 real row / 0 padded row)
    w1 = w1_ref[...].astype(jnp.bfloat16)  # [D, D]
    b1 = b1_ref[...]                       # [1, D] f32
    w2 = w2_ref[...].astype(jnp.bfloat16)  # [D, D]
    b2 = b2_ref[...]                       # [1, D] f32

    # Row-normalize adj once and reuse for both GCN layers.  The reciprocal goes
    # to the EUP slot; adj_n is then a bf16 MXU operand.
    inv_denom = pl.reciprocal(jnp.sum(adjm, axis=2, keepdims=True) + 1.0,
                              approx=True)                       # [TB, S, 1]
    adj_n = (adjm * inv_denom).astype(jnp.bfloat16)              # [TB, S, S]

    # --- gc1: flattened [(TB*S), D] @ [D, D] feature matmul, bf16 MXU / f32 acc ---
    w = (wpos * ctx).reshape(TB * S, D).astype(jnp.bfloat16)
    h1 = jnp.dot(w, w1, preferred_element_type=jnp.float32).reshape(TB, S, D)
    g1 = jnp.einsum('bij,bjd->bid', adj_n, h1.astype(jnp.bfloat16),
                    preferred_element_type=jnp.float32) + b1
    x = jnp.maximum(g1, 0.0)

    # --- gc2 ---
    xw = (wpos * x).reshape(TB * S, D).astype(jnp.bfloat16)
    h2 = jnp.dot(xw, w2, preferred_element_type=jnp.float32).reshape(TB, S, D)
    g2 = jnp.einsum('bij,bjd->bid', adj_n, h2.astype(jnp.bfloat16),
                    preferred_element_type=jnp.float32) + b2
    x = jnp.maximum(g2, 0.0)

    # --- attention pooling ---
    # aspect-mask multiply + sum over S fused into one tiny [1,S]@[S,D] MXU matmul.
    xsum = jnp.einsum('bqs,bsd->bqd', mrow, x,
                      preferred_element_type=jnp.float32)        # [TB, 1, D]
    # Scores computed column-wise so the big [S,D] ctx tile is never transposed.
    s_col = jnp.sum(ctx * xsum, axis=2, keepdims=True)           # [TB, S, 1]
    smax = jnp.max(s_col, axis=1, keepdims=True)                 # [TB, 1, 1]
    e = jnp.exp(s_col - smax) * valid                            # padded rows -> 0
    denom = jnp.sum(e, axis=1, keepdims=True)                    # [TB, 1, 1]
    alpha = e * pl.reciprocal(denom, approx=True)                # [TB, S, 1]
    pooled_ref[...] = jnp.sum(alpha * ctx, axis=1, keepdims=True)  # [TB, 1, D]


def _vmem_estimate(tb, sp, dp):
    """Rough per-step VMEM working set (bytes), with conservative margins."""
    blocks = 4 * tb * (sp * dp + sp * sp + 2 * sp + dp) + 4 * sp   # in/out blocks
    weights = 2 * 4 * 2 * (dp * dp + dp)                           # worst case x2 buf
    temps = 4 * tb * (6 * sp * dp + sp * sp)                       # live temporaries
    return 2 * blocks + weights + temps


def _pick_tb(B, sp, dp, target_rows=512, vmem_budget=24 << 20):
    """Batch tile: ~target_rows flattened MXU rows per step within the VMEM budget,
    preferring >= 2 grid steps so both v7x TensorCores get work."""
    divs = [c for c in range(1, B + 1) if B % c == 0]
    ok = [c for c in divs
          if c * sp <= max(target_rows, sp) and _vmem_estimate(c, sp, dp) <= vmem_budget]
    pref = [c for c in ok if (B // c) >= 2]
    pool = pref or ok or [1]
    return max(pool)


def sdgcn_forward(context_feat, adj, pos_w, mask, params, *, tb=None):
    B, S, D = context_feat.shape
    Sp = _round_up(S, 8)        # free f32 reshapes + aligned adj contraction
    Dp = _round_up(D, 128)      # lane-dense tiles and unmasked stores
    if tb is None:
        tb = _pick_tb(B, Sp, Dp)
    assert B % tb == 0

    f32 = jnp.float32
    ctx_p = jnp.pad(context_feat.astype(f32), ((0, 0), (0, Sp - S), (0, Dp - D)))
    adj_p = jnp.pad(adj.astype(f32), ((0, 0), (0, Sp - S), (0, Sp - S)))
    posw_p = jnp.pad(pos_w.astype(f32), ((0, 0), (0, Sp - S), (0, 0)))
    mrow_p = jnp.pad(jnp.swapaxes(mask.astype(f32), 1, 2),
                     ((0, 0), (0, 0), (0, Sp - S)))               # [B, 1, Sp]
    valid = jnp.pad(jnp.ones((1, S, 1), f32), ((0, 0), (0, Sp - S), (0, 0)))

    w1_p = jnp.pad(params["w1"].astype(f32), ((0, Dp - D), (0, Dp - D)))
    b1_p = jnp.pad(params["b1"].astype(f32), ((0, 0), (0, Dp - D)))
    w2_p = jnp.pad(params["w2"].astype(f32), ((0, Dp - D), (0, Dp - D)))
    b2_p = jnp.pad(params["b2"].astype(f32), ((0, 0), (0, Dp - D)))

    vmem_limit = min(64 << 20, max(16 << 20, 2 * _vmem_estimate(tb, Sp, Dp)))

    def build(const_kwargs):
        def cspec(shape):
            return pl.BlockSpec(shape, lambda b: (0,) * len(shape), **const_kwargs)

        grid_spec = pltpu.PrefetchScalarGridSpec(
            num_scalar_prefetch=0,
            grid=(B // tb,),
            in_specs=[
                pl.BlockSpec((tb, Sp, Dp), lambda b: (b, 0, 0)),   # context
                pl.BlockSpec((tb, Sp, Sp), lambda b: (b, 0, 0)),   # adj
                pl.BlockSpec((tb, Sp, 1), lambda b: (b, 0, 0)),    # position weight
                pl.BlockSpec((tb, 1, Sp), lambda b: (b, 0, 0)),    # aspect mask row
                cspec((1, Sp, 1)),                                 # seq-valid mask
                cspec((Dp, Dp)),                                   # gc1.weight
                cspec((1, Dp)),                                    # gc1.bias
                cspec((Dp, Dp)),                                   # gc2.weight
                cspec((1, Dp)),                                    # gc2.bias
            ],
            out_specs=pl.BlockSpec((tb, 1, Dp), lambda b: (b, 0, 0)),
        )
        return pl.pallas_call(
            sdgcn_kernel,
            out_shape=jax.ShapeDtypeStruct((B, 1, Dp), jnp.float32),
            grid_spec=grid_spec,
            compiler_params=pltpu.CompilerParams(
                dimension_semantics=("parallel",),
                vmem_limit_bytes=vmem_limit),
        )

    args = (ctx_p, adj_p, posw_p, mrow_p, valid, w1_p, b1_p, w2_p, b2_p)
    try:
        # Constant-index weights/biases never change between grid steps:
        # single-buffer them to reclaim VMEM headroom.
        pooled = build(dict(pipeline_mode=pl.Buffered(1)))(*args)
    except Exception:
        # Fallback if single-buffering is rejected by this jax/Mosaic version.
        pooled = build({})(*args)

    pooled = pooled[:, 0, :D]                                      # strip padding
    # Tiny [D, P] fc (P=3 -> lane-sparse) stays in plain XLA so the kernel's
    # stored output is a lane-dense [TB, 1, Dp] slab.
    return pooled @ params["wfc"] + params["bfc"][0]


# ---------- plain-JAX glue (index-derived weight / mask vectors) ----------
def position_weight_vec(aspect_double_idx, text_len, aspect_len, seq_len):
    start = aspect_double_idx[:, 0:1].astype(jnp.float32)
    end = aspect_double_idx[:, 1:2].astype(jnp.float32)
    tl = text_len[:, None].astype(jnp.float32)
    # NOTE: cl == 0 when the whole sentence is the aspect -> inf/NaN weights.
    # This matches the torch reference (which divides by context_len as well).
    cl = (text_len - aspect_len)[:, None].astype(jnp.float32)
    j = jnp.arange(seq_len, dtype=jnp.float32)[None, :]
    w = jnp.where(j < start, 1.0 - (start - j) / cl,
        jnp.where(j <= end, 0.0,
        jnp.where(j < tl, 1.0 - (j - end) / cl, 0.0)))
    return w  # [B, S]


def aspect_mask_vec(aspect_double_idx, seq_len):
    start = aspect_double_idx[:, 0:1]
    end = aspect_double_idx[:, 1:2]
    j = jnp.arange(seq_len)[None, :]
    return ((j >= start) & (j <= end)).astype(jnp.float32)  # [B, S]


# ---------- pure-JAX reference (same bf16 MXU precision as the kernel) ----------
def ref_forward(ctx, adj, pos_w, msk, p):
    bf16 = jnp.bfloat16
    denom = jnp.sum(adj, axis=2, keepdims=True) + 1.0
    adj_n = (adj / denom).astype(bf16)

    def gc(xin, w, b):
        h = jnp.einsum('bsd,de->bse', xin.astype(bf16), w.astype(bf16),
                       preferred_element_type=jnp.float32)
        g = jnp.einsum('bij,bjd->bid', adj_n, h.astype(bf16),
                       preferred_element_type=jnp.float32)
        return g + b

    x = jax.nn.relu(gc(pos_w * ctx, p["w1"], p["b1"][0]))
    x = jax.nn.relu(gc(pos_w * x, p["w2"], p["b2"][0]))
    x = msk * x
    alpha_mat = jnp.einsum('bqd,bkd->bqk', x, ctx)
    alpha = jax.nn.softmax(jnp.sum(alpha_mat, axis=1, keepdims=True), axis=2)
    pooled = jnp.einsum('bqk,bkd->bqd', alpha, ctx)[:, 0, :]
    return pooled @ p["wfc"] + p["bfc"][0]


if __name__ == "__main__":
    key = jax.random.PRNGKey(0)
    B, S, hidden_dim, P = 2, 16, 16, 3
    D = 2 * hidden_dim  # bidirectional LSTM output width

    # Deterministic token-id stand-ins for (context, aspect, left_indices)
    text_len_t = jnp.array([12, 16], dtype=jnp.int32)
    aspect_len_t = jnp.array([2, 3], dtype=jnp.int32)
    left_len_t = jnp.array([3, 5], dtype=jnp.int32)
    j = jnp.arange(S)[None, :]
    context_ids = jnp.where(j < text_len_t[:, None], j + 1, 0)
    aspect_ids = jnp.where(jnp.arange(4)[None, :] < aspect_len_t[:, None], 1, 0)
    left_ids = jnp.where(j < left_len_t[:, None], 1, 0)

    # forward-pass length logic (matches the torch code)
    context_len = jnp.sum(context_ids != 0, axis=-1)
    aspect_len = jnp.sum(aspect_ids != 0, axis=-1)
    left_len = jnp.sum(left_ids != 0, axis=-1)
    aspect_double_idx = jnp.stack([left_len, left_len + aspect_len - 1], axis=1)

    keys = jax.random.split(key, 8)
    # TODO(synk): stands in for bert(...)[2][-4:].sum -> dropout -> BiLSTM output.
    context_feat = jax.random.normal(keys[0], (B, S, D), jnp.float32)
    adj = (jax.random.uniform(keys[1], (B, S, S)) < 0.4).astype(jnp.float32)

    sc = 1.0 / jnp.sqrt(jnp.float32(D))
    params = dict(
        w1=jax.random.normal(keys[2], (D, D), jnp.float32) * sc,
        b1=jax.random.normal(keys[3], (1, D), jnp.float32) * 0.1,
        w2=jax.random.normal(keys[4], (D, D), jnp.float32) * sc,
        b2=jax.random.normal(keys[5], (1, D), jnp.float32) * 0.1,
        wfc=jax.random.normal(keys[6], (D, P), jnp.float32) * sc,
        bfc=jax.random.normal(keys[7], (1, P), jnp.float32) * 0.1,
    )

    pos_w = position_weight_vec(aspect_double_idx, context_len, aspect_len, S)[:, :, None]
    msk = aspect_mask_vec(aspect_double_idx, S)[:, :, None]

    out = sdgcn_forward(context_feat, adj, pos_w, msk, params)
    out = jax.block_until_ready(out)

    ref = ref_forward(context_feat, adj, pos_w, msk, params)
    assert out.shape == (B, P)
    assert jnp.allclose(out, ref, atol=1e-2, rtol=1e-2), (
        float(jnp.max(jnp.abs(out - ref))))
    print("KERNEL_OK")
</pallas_src>

<mosaic_0001>
module attributes {stable_mosaic.version = 11 : i64} {
  func.func @sdgcn_kernel(%arg0: i32, %arg1: memref<1x16x128xf32, #tpu.memory_space<vmem>>, %arg2: memref<1x16x16xf32, #tpu.memory_space<vmem>>, %arg3: memref<1x16x1xf32, #tpu.memory_space<vmem>>, %arg4: memref<1x1x16xf32, #tpu.memory_space<vmem>>, %arg5: memref<1x16x1xf32, #tpu.memory_space<vmem>>, %arg6: memref<128x128xf32, #tpu.memory_space<vmem>>, %arg7: memref<1x128xf32, #tpu.memory_space<vmem>>, %arg8: memref<128x128xf32, #tpu.memory_space<vmem>>, %arg9: memref<1x128xf32, #tpu.memory_space<vmem>>, %arg10: memref<1x1x128xf32, #tpu.memory_space<vmem>>) attributes {dimension_semantics = [#tpu.dimension_semantics<parallel>], iteration_bounds = array<i64: 2>, scalar_prefetch = 0 : i64, scratch_operands = 0 : i64, tpu.core_type = #tpu.core_type<tc>, window_params = [{transform_indices = @transform_0, window_bounds = array<i64: 1, 16, 128>}, {transform_indices = @transform_1, window_bounds = array<i64: 1, 16, 16>}, {transform_indices = @transform_2, window_bounds = array<i64: 1, 16, 1>}, {transform_indices = @transform_3, window_bounds = array<i64: 1, 1, 16>}, {pipeline_mode = #tpu.pipeline_mode<synchronous>, transform_indices = @transform_4, window_bounds = array<i64: 1, 16, 1>}, {pipeline_mode = #tpu.pipeline_mode<synchronous>, transform_indices = @transform_5, window_bounds = array<i64: 128, 128>}, {pipeline_mode = #tpu.pipeline_mode<synchronous>, transform_indices = @transform_6, window_bounds = array<i64: 1, 128>}, {pipeline_mode = #tpu.pipeline_mode<synchronous>, transform_indices = @transform_7, window_bounds = array<i64: 128, 128>}, {pipeline_mode = #tpu.pipeline_mode<synchronous>, transform_indices = @transform_8, window_bounds = array<i64: 1, 128>}, {transform_indices = @transform_9, window_bounds = array<i64: 1, 1, 128>}]} {
    %c0 = arith.constant 0 : index
    %c0_0 = arith.constant 0 : index
    %c0_1 = arith.constant 0 : index
    %0 = vector.load %arg1[%c0, %c0_0, %c0_1] : memref<1x16x128xf32, #tpu.memory_space<vmem>>, vector<1x16x128xf32>
    %c0_2 = arith.constant 0 : index
    %c0_3 = arith.constant 0 : index
    %c0_4 = arith.constant 0 : index
    %1 = vector.load %arg2[%c0_2, %c0_3, %c0_4] : memref<1x16x16xf32, #tpu.memory_space<vmem>>, vector<1x16x16xf32>
    %c0_5 = arith.constant 0 : index
    %c0_6 = arith.constant 0 : index
    %c0_7 = arith.constant 0 : index
    %2 = vector.load %arg3[%c0_5, %c0_6, %c0_7] : memref<1x16x1xf32, #tpu.memory_space<vmem>>, vector<1x16x1xf32>
    %c0_8 = arith.constant 0 : index
    %c0_9 = arith.constant 0 : index
    %c0_10 = arith.constant 0 : index
    %3 = vector.load %arg4[%c0_8, %c0_9, %c0_10] : memref<1x1x16xf32, #tpu.memory_space<vmem>>, vector<1x1x16xf32>
    %c0_11 = arith.constant 0 : index
    %c0_12 = arith.constant 0 : index
    %c0_13 = arith.constant 0 : index
    %4 = vector.load %arg5[%c0_11, %c0_12, %c0_13] : memref<1x16x1xf32, #tpu.memory_space<vmem>>, vector<1x16x1xf32>
    %c0_14 = arith.constant 0 : index
    %c0_15 = arith.constant 0 : index
    %5 = vector.load %arg6[%c0_14, %c0_15] : memref<128x128xf32, #tpu.memory_space<vmem>>, vector<128x128xf32>
    %6 = arith.truncf %5 : vector<128x128xf32> to vector<128x128xbf16>
    %c0_16 = arith.constant 0 : index
    %c0_17 = arith.constant 0 : index
    %7 = vector.load %arg7[%c0_16, %c0_17] : memref<1x128xf32, #tpu.memory_space<vmem>>, vector<1x128xf32>
    %c0_18 = arith.constant 0 : index
    %c0_19 = arith.constant 0 : index
    %8 = vector.load %arg8[%c0_18, %c0_19] : memref<128x128xf32, #tpu.memory_space<vmem>>, vector<128x128xf32>
    %9 = arith.truncf %8 : vector<128x128xf32> to vector<128x128xbf16>
    %c0_20 = arith.constant 0 : index
    %c0_21 = arith.constant 0 : index
    %10 = vector.load %arg9[%c0_20, %c0_21] : memref<1x128xf32, #tpu.memory_space<vmem>>, vector<1x128xf32>
    %cst = arith.constant dense<0.000000e+00> : vector<1x16xf32>
    %11 = vector.multi_reduction <add>, %1, %cst [2] : vector<1x16x16xf32> to vector<1x16xf32>
    %12 = vector.shape_cast %11 : vector<1x16xf32> to vector<1x16x1xf32>
    %cst_22 = arith.constant 1.000000e+00 : f32
    %13 = vector.broadcast %cst_22 : f32 to vector<1x16x1xf32>
    %14 = arith.addf %12, %13 : vector<1x16x1xf32>
    %15 = tpu.reciprocal %14 {approx = true} : vector<1x16x1xf32> -> vector<1x16x1xf32>
    %16 = vector.broadcast %15 : vector<1x16x1xf32> to vector<1x16x16xf32>
    %17 = arith.mulf %1, %16 : vector<1x16x16xf32>
    %18 = arith.truncf %17 : vector<1x16x16xf32> to vector<1x16x16xbf16>
    %19 = vector.broadcast %2 : vector<1x16x1xf32> to vector<1x16x128xf32>
    %20 = arith.mulf %19, %0 : vector<1x16x128xf32>
    %21 = vector.shape_cast %20 : vector<1x16x128xf32> to vector<16x128xf32>
    %22 = arith.truncf %21 : vector<16x128xf32> to vector<16x128xbf16>
    %cst_23 = arith.constant dense<0.000000e+00> : vector<16x128xf32>
    %23 = tpu.matmul %22, %6, %cst_23 {dimension_numbers = #tpu.dot_dimension_numbers<[1], [0], [0], [1], [0, 0, 1, 1], [], []>} : vector<16x128xbf16>, vector<128x128xbf16>, vector<16x128xf32> -> vector<16x128xf32>
    %24 = vector.shape_cast %23 : vector<16x128xf32> to vector<1x16x128xf32>
    %25 = arith.truncf %24 : vector<1x16x128xf32> to vector<1x16x128xbf16>
    "tpu.trace_start"() <{level = 10 : i32, message = "bij,bjd->bid"}> : () -> ()
    %cst_24 = arith.constant dense<0.000000e+00> : vector<1x16x128xf32>
    %26 = tpu.matmul %18, %25, %cst_24 {dimension_numbers = #tpu.dot_dimension_numbers<[2], [1], [1], [2], [0, 0, 0, 1, 1, 2], [0], [0]>} : vector<1x16x16xbf16>, vector<1x16x128xbf16>, vector<1x16x128xf32> -> vector<1x16x128xf32>
    "tpu.trace_stop"() : () -> ()
    %27 = vector.shape_cast %7 : vector<1x128xf32> to vector<1x1x128xf32>
    %28 = vector.broadcast %27 : vector<1x1x128xf32> to vector<1x16x128xf32>
    %29 = arith.addf %26, %28 : vector<1x16x128xf32>
    %cst_25 = arith.constant 0.000000e+00 : f32
    %30 = vector.broadcast %cst_25 : f32 to vector<1x16x128xf32>
    %31 = arith.maximumf %29, %30 : vector<1x16x128xf32>
    %32 = vector.broadcast %2 : vector<1x16x1xf32> to vector<1x16x128xf32>
    %33 = arith.mulf %32, %31 : vector<1x16x128xf32>
    %34 = vector.shape_cast %33 : vector<1x16x128xf32> to vector<16x128xf32>
    %35 = arith.truncf %34 : vector<16x128xf32> to vector<16x128xbf16>
    %cst_26 = arith.constant dense<0.000000e+00> : vector<16x128xf32>
    %36 = tpu.matmul %35, %9, %cst_26 {dimension_numbers = #tpu.dot_dimension_numbers<[1], [0], [0], [1], [0, 0, 1, 1], [], []>} : vector<16x128xbf16>, vector<128x128xbf16>, vector<16x128xf32> -> vector<16x128xf32>
    %37 = vector.shape_cast %36 : vector<16x128xf32> to vector<1x16x128xf32>
    %38 = arith.truncf %37 : vector<1x16x128xf32> to vector<1x16x128xbf16>
    "tpu.trace_start"() <{level = 10 : i32, message = "bij,bjd->bid"}> : () -> ()
    %cst_27 = arith.constant dense<0.000000e+00> : vector<1x16x128xf32>
    %39 = tpu.matmul %18, %38, %cst_27 {dimension_numbers = #tpu.dot_dimension_numbers<[2], [1], [1], [2], [0, 0, 0, 1, 1, 2], [0], [0]>} : vector<1x16x16xbf16>, vector<1x16x128xbf16>, vector<1x16x128xf32> -> vector<1x16x128xf32>
    "tpu.trace_stop"() : () -> ()
    %40 = vector.shape_cast %10 : vector<1x128xf32> to vector<1x1x128xf32>
    %41 = vector.broadcast %40 : vector<1x1x128xf32> to vector<1x16x128xf32>
    %42 = arith.addf %39, %41 : vector<1x16x128xf32>
    %cst_28 = arith.constant 0.000000e+00 : f32
    %43 = vector.broadcast %cst_28 : f32 to vector<1x16x128xf32>
    %44 = arith.maximumf %42, %43 : vector<1x16x128xf32>
    "tpu.trace_start"() <{level = 10 : i32, message = "bqs,bsd->bqd"}> : () -> ()
    %cst_29 = arith.constant dense<0.000000e+00> : vector<1x1x128xf32>
    %45 = tpu.matmul %3, %44, %cst_29 {dimension_numbers = #tpu.dot_dimension_numbers<[2], [1], [1], [2], [0, 0, 0, 1, 1, 2], [0], [0]>} : vector<1x1x16xf32>, vector<1x16x128xf32>, vector<1x1x128xf32> -> vector<1x1x128xf32>
    "tpu.trace_stop"() : () -> ()
    %46 = vector.broadcast %45 : vector<1x1x128xf32> to vector<1x16x128xf32>
    %47 = arith.mulf %0, %46 : vector<1x16x128xf32>
    %cst_30 = arith.constant dense<0.000000e+00> : vector<1x16xf32>
    %48 = vector.multi_reduction <add>, %47, %cst_30 [2] : vector<1x16x128xf32> to vector<1x16xf32>
    %49 = vector.shape_cast %48 : vector<1x16xf32> to vector<1x16x1xf32>
    %cst_31 = arith.constant dense<0xFF800000> : vector<1x1xf32>
    %50 = vector.multi_reduction <maximumf>, %49, %cst_31 [1] : vector<1x16x1xf32> to vector<1x1xf32>
    %51 = vector.shape_cast %50 : vector<1x1xf32> to vector<1x1x1xf32>
    %52 = vector.broadcast %51 : vector<1x1x1xf32> to vector<1x16x1xf32>
    %53 = arith.subf %49, %52 : vector<1x16x1xf32>
    %54 = math.exp %53 : vector<1x16x1xf32>
    %55 = arith.mulf %54, %4 : vector<1x16x1xf32>
    %cst_32 = arith.constant dense<0.000000e+00> : vector<1x1xf32>
    %56 = vector.multi_reduction <add>, %55, %cst_32 [1] : vector<1x16x1xf32> to vector<1x1xf32>
    %57 = vector.shape_cast %56 : vector<1x1xf32> to vector<1x1x1xf32>
    %58 = tpu.reciprocal %57 {approx = true} : vector<1x1x1xf32> -> vector<1x1x1xf32>
    %59 = vector.broadcast %58 : vector<1x1x1xf32> to vector<1x16x1xf32>
    %60 = arith.mulf %55, %59 : vector<1x16x1xf32>
    %61 = vector.broadcast %60 : vector<1x16x1xf32> to vector<1x16x128xf32>
    %62 = arith.mulf %61, %0 : vector<1x16x128xf32>
    %cst_33 = arith.constant dense<0.000000e+00> : vector<1x128xf32>
    %63 = vector.multi_reduction <add>, %62, %cst_33 [1] : vector<1x16x128xf32> to vector<1x128xf32>
    %64 = vector.shape_cast %63 : vector<1x128xf32> to vector<1x1x128xf32>
    %c0_34 = arith.constant 0 : index
    %c0_35 = arith.constant 0 : index
    %c0_36 = arith.constant 0 : index
    %65 = vector.load %arg10[%c0_34, %c0_35, %c0_36] : memref<1x1x128xf32, #tpu.memory_space<vmem>>, vector<1x1x128xf32>
    tpu.vector_store %arg10[%c0_34, %c0_35, %c0_36], %64 {strides = array<i32>} : memref<1x1x128xf32, #tpu.memory_space<vmem>>, vector<1x1x128xf32>,
    return
  }
  func.func @transform_0(%arg0: i32) -> (i32, i32, i32) {
    %c0_i32 = arith.constant 0 : i32
    %c0_i32_0 = arith.constant 0 : i32
    %c0_i32_1 = arith.constant 0 : i32
    return %arg0, %c0_i32, %c0_i32_0 : i32, i32, i32
  }
  func.func @transform_1(%arg0: i32) -> (i32, i32, i32) {
    %c0_i32 = arith.constant 0 : i32
    %c0_i32_0 = arith.constant 0 : i32
    %c0_i32_1 = arith.constant 0 : i32
    return %arg0, %c0_i32, %c0_i32_0 : i32, i32, i32
  }
  func.func @transform_2(%arg0: i32) -> (i32, i32, i32) {
    %c0_i32 = arith.constant 0 : i32
    %c0_i32_0 = arith.constant 0 : i32
    %c0_i32_1 = arith.constant 0 : i32
    return %arg0, %c0_i32, %c0_i32_0 : i32, i32, i32
  }
  func.func @transform_3(%arg0: i32) -> (i32, i32, i32) {
    %c0_i32 = arith.constant 0 : i32
    %c0_i32_0 = arith.constant 0 : i32
    %c0_i32_1 = arith.constant 0 : i32
    return %arg0, %c0_i32, %c0_i32_0 : i32, i32, i32
  }
  func.func @transform_4(%arg0: i32) -> (i32, i32, i32) {
    %c0_i32 = arith.constant 0 : i32
    %c0_i32_0 = arith.constant 0 : i32
    %c0_i32_1 = arith.constant 0 : i32
    %c0_i32_2 = arith.constant 0 : i32
    return %c0_i32, %c0_i32_0, %c0_i32_1 : i32, i32, i32
  }
  func.func @transform_5(%arg0: i32) -> (i32, i32) {
    %c0_i32 = arith.constant 0 : i32
    %c0_i32_0 = arith.constant 0 : i32
    %c0_i32_1 = arith.constant 0 : i32
    return %c0_i32, %c0_i32_0 : i32, i32
  }
  func.func @transform_6(%arg0: i32) -> (i32, i32) {
    %c0_i32 = arith.constant 0 : i32
    %c0_i32_0 = arith.constant 0 : i32
    %c0_i32_1 = arith.constant 0 : i32
    return %c0_i32, %c0_i32_0 : i32, i32
  }
  func.func @transform_7(%arg0: i32) -> (i32, i32) {
    %c0_i32 = arith.constant 0 : i32
    %c0_i32_0 = arith.constant 0 : i32
    %c0_i32_1 = arith.constant 0 : i32
    return %c0_i32, %c0_i32_0 : i32, i32
  }
  func.func @transform_8(%arg0: i32) -> (i32, i32) {
    %c0_i32 = arith.constant 0 : i32
    %c0_i32_0 = arith.constant 0 : i32
    %c0_i32_1 = arith.constant 0 : i32
    return %c0_i32, %c0_i32_0 : i32, i32
  }
  func.func @transform_9(%arg0: i32) -> (i32, i32, i32) {
    %c0_i32 = arith.constant 0 : i32
    %c0_i32_0 = arith.constant 0 : i32
    %c0_i32_1 = arith.constant 0 : i32
    return %arg0, %c0_i32, %c0_i32_0 : i32, i32, i32
  }
}

module attributes {stable_mosaic.version = 11 : i64} {
  func.func @sdgcn_kernel(%arg0: i32, %arg1: memref<1x16x128xf32, #tpu.memory_space<vmem>>, %arg2: memref<1x16x16xf32, #tpu.memory_space<vmem>>, %arg3: memref<1x16x1xf32, #tpu.memory_space<vmem>>, %arg4: memref<1x1x16xf32, #tpu.memory_space<vmem>>, %arg5: memref<1x16x1xf32, #tpu.memory_space<vmem>>, %arg6: memref<128x128xf32, #tpu.memory_space<vmem>>, %arg7: memref<1x128xf32, #tpu.memory_space<vmem>>, %arg8: memref<128x128xf32, #tpu.memory_space<vmem>>, %arg9: memref<1x128xf32, #tpu.memory_space<vmem>>, %arg10: memref<1x1x128xf32, #tpu.memory_space<vmem>>) attributes {dimension_semantics = [#tpu.dimension_semantics<parallel>], iteration_bounds = array<i64: 2>, scalar_prefetch = 0 : i64, scratch_operands = 0 : i64, tpu.core_type = #tpu.core_type<tc>, window_params = [{transform_indices = @transform_0, window_bounds = array<i64: 1, 16, 128>}, {transform_indices = @transform_1, window_bounds = array<i64: 1, 16, 16>}, {transform_indices = @transform_2, window_bounds = array<i64: 1, 16, 1>}, {transform_indices = @transform_3, window_bounds = array<i64: 1, 1, 16>}, {pipeline_mode = #tpu.pipeline_mode<synchronous>, transform_indices = @transform_4, window_bounds = array<i64: 1, 16, 1>}, {pipeline_mode = #tpu.pipeline_mode<synchronous>, transform_indices = @transform_5, window_bounds = array<i64: 128, 128>}, {pipeline_mode = #tpu.pipeline_mode<synchronous>, transform_indices = @transform_6, window_bounds = array<i64: 1, 128>}, {pipeline_mode = #tpu.pipeline_mode<synchronous>, transform_indices = @transform_7, window_bounds = array<i64: 128, 128>}, {pipeline_mode = #tpu.pipeline_mode<synchronous>, transform_indices = @transform_8, window_bounds = array<i64: 1, 128>}, {transform_indices = @transform_9, window_bounds = array<i64: 1, 1, 128>}]} {
    %c0 = arith.constant 0 : index
    %c0_0 = arith.constant 0 : index
    %c0_1 = arith.constant 0 : index
    %0 = vector.load %arg1[%c0, %c0_0, %c0_1] : memref<1x16x128xf32, #tpu.memory_space<vmem>>, vector<1x16x128xf32>
    %c0_2 = arith.constant 0 : index
    %c0_3 = arith.constant 0 : index
    %c0_4 = arith.constant 0 : index
    %1 = vector.load %arg2[%c0_2, %c0_3, %c0_4] : memref<1x16x16xf32, #tpu.memory_space<vmem>>, vector<1x16x16xf32>
    %c0_5 = arith.constant 0 : index
    %c0_6 = arith.constant 0 : index
    %c0_7 = arith.constant 0 : index
    %2 = vector.load %arg3[%c0_5, %c0_6, %c0_7] : memref<1x16x1xf32, #tpu.memory_space<vmem>>, vector<1x16x1xf32>
    %c0_8 = arith.constant 0 : index
    %c0_9 = arith.constant 0 : index
    %c0_10 = arith.constant 0 : index
    %3 = vector.load %arg4[%c0_8, %c0_9, %c0_10] : memref<1x1x16xf32, #tpu.memory_space<vmem>>, vector<1x1x16xf32>
    %c0_11 = arith.constant 0 : index
    %c0_12 = arith.constant 0 : index
    %c0_13 = arith.constant 0 : index
    %4 = vector.load %arg5[%c0_11, %c0_12, %c0_13] : memref<1x16x1xf32, #tpu.memory_space<vmem>>, vector<1x16x1xf32>
    %c0_14 = arith.constant 0 : index
    %c0_15 = arith.constant 0 : index
    %5 = vector.load %arg6[%c0_14, %c0_15] : memref<128x128xf32, #tpu.memory_space<vmem>>, vector<128x128xf32>
    %6 = arith.truncf %5 : vector<128x128xf32> to vector<128x128xbf16>
    %c0_16 = arith.constant 0 : index
    %c0_17 = arith.constant 0 : index
    %7 = vector.load %arg7[%c0_16, %c0_17] : memref<1x128xf32, #tpu.memory_space<vmem>>, vector<1x128xf32>
    %c0_18 = arith.constant 0 : index
    %c0_19 = arith.constant 0 : index
    %8 = vector.load %arg8[%c0_18, %c0_19] : memref<128x128xf32, #tpu.memory_space<vmem>>, vector<128x128xf32>
    %9 = arith.truncf %8 : vector<128x128xf32> to vector<128x128xbf16>
    %c0_20 = arith.constant 0 : index
    %c0_21 = arith.constant 0 : index
    %10 = vector.load %arg9[%c0_20, %c0_21] : memref<1x128xf32, #tpu.memory_space<vmem>>, vector<1x128xf32>
    %cst = arith.constant dense<0.000000e+00> : vector<1x16xf32>
    %11 = vector.multi_reduction <add>, %1, %cst [2] : vector<1x16x16xf32> to vector<1x16xf32>
    %12 = vector.shape_cast %11 : vector<1x16xf32> to vector<1x16x1xf32>
    %cst_22 = arith.constant 1.000000e+00 : f32
    %13 = vector.broadcast %cst_22 : f32 to vector<1x16x1xf32>
    %14 = arith.addf %12, %13 : vector<1x16x1xf32>
    %15 = tpu.reciprocal %14 {approx = true} : vector<1x16x1xf32> -> vector<1x16x1xf32>
    %16 = vector.broadcast %15 : vector<1x16x1xf32> to vector<1x16x16xf32>
    %17 = arith.mulf %1, %16 : vector<1x16x16xf32>
    %18 = arith.truncf %17 : vector<1x16x16xf32> to vector<1x16x16xbf16>
    %19 = vector.broadcast %2 : vector<1x16x1xf32> to vector<1x16x128xf32>
    %20 = arith.mulf %19, %0 : vector<1x16x128xf32>
    %21 = vector.shape_cast %20 : vector<1x16x128xf32> to vector<16x128xf32>
    %22 = arith.truncf %21 : vector<16x128xf32> to vector<16x128xbf16>
    %cst_23 = arith.constant dense<0.000000e+00> : vector<16x128xf32>
    %23 = tpu.matmul %22, %6, %cst_23 {dimension_numbers = #tpu.dot_dimension_numbers<[1], [0], [0], [1], [0, 0, 1, 1], [], []>} : vector<16x128xbf16>, vector<128x128xbf16>, vector<16x128xf32> -> vector<16x128xf32>
    %24 = vector.shape_cast %23 : vector<16x128xf32> to vector<1x16x128xf32>
    %25 = arith.truncf %24 : vector<1x16x128xf32> to vector<1x16x128xbf16>
    "tpu.trace_start"() <{level = 10 : i32, message = "bij,bjd->bid"}> : () -> ()
    %cst_24 = arith.constant dense<0.000000e+00> : vector<1x16x128xf32>
    %26 = tpu.matmul %18, %25, %cst_24 {dimension_numbers = #tpu.dot_dimension_numbers<[2], [1], [1], [2], [0, 0, 0, 1, 1, 2], [0], [0]>} : vector<1x16x16xbf16>, vector<1x16x128xbf16>, vector<1x16x128xf32> -> vector<1x16x128xf32>
    "tpu.trace_stop"() : () -> ()
    %27 = vector.shape_cast %7 : vector<1x128xf32> to vector<1x1x128xf32>
    %28 = vector.broadcast %27 : vector<1x1x128xf32> to vector<1x16x128xf32>
    %29 = arith.addf %26, %28 : vector<1x16x128xf32>
    %cst_25 = arith.constant 0.000000e+00 : f32
    %30 = vector.broadcast %cst_25 : f32 to vector<1x16x128xf32>
    %31 = arith.maximumf %29, %30 : vector<1x16x128xf32>
    %32 = vector.broadcast %2 : vector<1x16x1xf32> to vector<1x16x128xf32>
    %33 = arith.mulf %32, %31 : vector<1x16x128xf32>
    %34 = vector.shape_cast %33 : vector<1x16x128xf32> to vector<16x128xf32>
    %35 = arith.truncf %34 : vector<16x128xf32> to vector<16x128xbf16>
    %cst_26 = arith.constant dense<0.000000e+00> : vector<16x128xf32>
    %36 = tpu.matmul %35, %9, %cst_26 {dimension_numbers = #tpu.dot_dimension_numbers<[1], [0], [0], [1], [0, 0, 1, 1], [], []>} : vector<16x128xbf16>, vector<128x128xbf16>, vector<16x128xf32> -> vector<16x128xf32>
    %37 = vector.shape_cast %36 : vector<16x128xf32> to vector<1x16x128xf32>
    %38 = arith.truncf %37 : vector<1x16x128xf32> to vector<1x16x128xbf16>
    "tpu.trace_start"() <{level = 10 : i32, message = "bij,bjd->bid"}> : () -> ()
    %cst_27 = arith.constant dense<0.000000e+00> : vector<1x16x128xf32>
    %39 = tpu.matmul %18, %38, %cst_27 {dimension_numbers = #tpu.dot_dimension_numbers<[2], [1], [1], [2], [0, 0, 0, 1, 1, 2], [0], [0]>} : vector<1x16x16xbf16>, vector<1x16x128xbf16>, vector<1x16x128xf32> -> vector<1x16x128xf32>
    "tpu.trace_stop"() : () -> ()
    %40 = vector.shape_cast %10 : vector<1x128xf32> to vector<1x1x128xf32>
    %41 = vector.broadcast %40 : vector<1x1x128xf32> to vector<1x16x128xf32>
    %42 = arith.addf %39, %41 : vector<1x16x128xf32>
    %cst_28 = arith.constant 0.000000e+00 : f32
    %43 = vector.broadcast %cst_28 : f32 to vector<1x16x128xf32>
    %44 = arith.maximumf %42, %43 : vector<1x16x128xf32>
    "tpu.trace_start"() <{level = 10 : i32, message = "bqs,bsd->bqd"}> : () -> ()
    %cst_29 = arith.constant dense<0.000000e+00> : vector<1x1x128xf32>
    %45 = tpu.matmul %3, %44, %cst_29 {dimension_numbers = #tpu.dot_dimension_numbers<[2], [1], [1], [2], [0, 0, 0, 1, 1, 2], [0], [0]>} : vector<1x1x16xf32>, vector<1x16x128xf32>, vector<1x1x128xf32> -> vector<1x1x128xf32>
    "tpu.trace_stop"() : () -> ()
    %46 = vector.broadcast %45 : vector<1x1x128xf32> to vector<1x16x128xf32>
    %47 = arith.mulf %0, %46 : vector<1x16x128xf32>
    %cst_30 = arith.constant dense<0.000000e+00> : vector<1x16xf32>
    %48 = vector.multi_reduction <add>, %47, %cst_30 [2] : vector<1x16x128xf32> to vector<1x16xf32>
    %49 = vector.shape_cast %48 : vector<1x16xf32> to vector<1x16x1xf32>
    %cst_31 = arith.constant dense<0xFF800000> : vector<1x1xf32>
    %50 = vector.multi_reduction <maximumf>, %49, %cst_31 [1] : vector<1x16x1xf32> to vector<1x1xf32>
    %51 = vector.shape_cast %50 : vector<1x1xf32> to vector<1x1x1xf32>
    %52 = vector.broadcast %51 : vector<1x1x1xf32> to vector<1x16x1xf32>
    %53 = arith.subf %49, %52 : vector<1x16x1xf32>
    %54 = math.exp %53 : vector<1x16x1xf32>
    %55 = arith.mulf %54, %4 : vector<1x16x1xf32>
    %cst_32 = arith.constant dense<0.000000e+00> : vector<1x1xf32>
    %56 = vector.multi_reduction <add>, %55, %cst_32 [1] : vector<1x16x1xf32> to vector<1x1xf32>
    %57 = vector.shape_cast %56 : vector<1x1xf32> to vector<1x1x1xf32>
    %58 = tpu.reciprocal %57 {approx = true} : vector<1x1x1xf32> -> vector<1x1x1xf32>
    %59 = vector.broadcast %58 : vector<1x1x1xf32> to vector<1x16x1xf32>
    %60 = arith.mulf %55, %59 : vector<1x16x1xf32>
    %61 = vector.broadcast %60 : vector<1x16x1xf32> to vector<1x16x128xf32>
    %62 = arith.mulf %61, %0 : vector<1x16x128xf32>
    %cst_33 = arith.constant dense<0.000000e+00> : vector<1x128xf32>
    %63 = vector.multi_reduction <add>, %62, %cst_33 [1] : vector<1x16x128xf32> to vector<1x128xf32>
    %64 = vector.shape_cast %63 : vector<1x128xf32> to vector<1x1x128xf32>
    %c0_34 = arith.constant 0 : index
    %c0_35 = arith.constant 0 : index
    %c0_36 = arith.constant 0 : index
    %65 = vector.load %arg10[%c0_34, %c0_35, %c0_36] : memref<1x1x128xf32, #tpu.memory_space<vmem>>, vector<1x1x128xf32>
    tpu.vector_store %arg10[%c0_34, %c0_35, %c0_36], %64 {strides = array<i32>} : memref<1x1x128xf32, #tpu.memory_space<vmem>>, vector<1x1x128xf32>,
    return
  }
  func.func @transform_0(%arg0: i32) -> (i32, i32, i32) {
    %c0_i32 = arith.constant 0 : i32
    %c0_i32_0 = arith.constant 0 : i32
    %c0_i32_1 = arith.constant 0 : i32
    return %arg0, %c0_i32, %c0_i32_0 : i32, i32, i32
  }
  func.func @transform_1(%arg0: i32) -> (i32, i32, i32) {
    %c0_i32 = arith.constant 0 : i32
    %c0_i32_0 = arith.constant 0 : i32
    %c0_i32_1 = arith.constant 0 : i32
    return %arg0, %c0_i32, %c0_i32_0 : i32, i32, i32
  }
  func.func @transform_2(%arg0: i32) -> (i32, i32, i32) {
    %c0_i32 = arith.constant 0 : i32
    %c0_i32_0 = arith.constant 0 : i32
    %c0_i32_1 = arith.constant 0 : i32
    return %arg0, %c0_i32, %c0_i32_0 : i32, i32, i32
  }
  func.func @transform_3(%arg0: i32) -> (i32, i32, i32) {
    %c0_i32 = arith.constant 0 : i32
    %c0_i32_0 = arith.constant 0 : i32
    %c0_i32_1 = arith.constant 0 : i32
    return %arg0, %c0_i32, %c0_i32_0 : i32, i32, i32
  }
  func.func @transform_4(%arg0: i32) -> (i32, i32, i32) {
    %c0_i32 = arith.constant 0 : i32
    %c0_i32_0 = arith.constant 0 : i32
    %c0_i32_1 = arith.constant 0 : i32
    %c0_i32_2 = arith.constant 0 : i32
    return %c0_i32, %c0_i32_0, %c0_i32_1 : i32, i32, i32
  }
  func.func @transform_5(%arg0: i32) -> (i32, i32) {
    %c0_i32 = arith.constant 0 : i32
    %c0_i32_0 = arith.constant 0 : i32
    %c0_i32_1 = arith.constant 0 : i32
    return %c0_i32, %c0_i32_0 : i32, i32
  }
  func.func @transform_6(%arg0: i32) -> (i32, i32) {
    %c0_i32 = arith.constant 0 : i32
    %c0_i32_0 = arith.constant 0 : i32
    %c0_i32_1 = arith.constant 0 : i32
    return %c0_i32, %c0_i32_0 : i32, i32
  }
  func.func @transform_7(%arg0: i32) -> (i32, i32) {
    %c0_i32 = arith.constant 0 : i32
    %c0_i32_0 = arith.constant 0 : i32
    %c0_i32_1 = arith.constant 0 : i32
    return %c0_i32, %c0_i32_0 : i32, i32
  }
  func.func @transform_8(%arg0: i32) -> (i32, i32) {
    %c0_i32 = arith.constant 0 : i32
    %c0_i32_0 = arith.constant 0 : i32
    %c0_i32_1 = arith.constant 0 : i32
    return %c0_i32, %c0_i32_0 : i32, i32
  }
  func.func @transform_9(%arg0: i32) -> (i32, i32, i32) {
    %c0_i32 = arith.constant 0 : i32
    %c0_i32_0 = arith.constant 0 : i32
    %c0_i32_1 = arith.constant 0 : i32
    return %arg0, %c0_i32, %c0_i32_0 : i32, i32, i32
  }
}

</mosaic_0001>

<bundles_post_ra>
// kernel: tpu_custom_call.1
= control target key start
LH: loop header
LB: loop body
LE: loop exit
PB: predicated region body
PF: predicated region fallthrough
CT: control target
= control target key end

     0   :  { %14 = vsyncpa [#allocation3], 0  ;;  %s1715_s0 = inlined_call_operand.vmem [shape: f32[2,16,128], index: 0, kind: input, shape index: {}]   ;;  %s1716_s1 = inlined_call_operand.hbm [shape: f32[2,16,16], index: 1, kind: input, shape index: {}]   ;;  %s1717_s2 = inlined_call_operand.vmem [shape: f32[2,16,1], index: 2, kind: input, shape index: {}]   ;;  %s1718_s3 = inlined_call_operand.vmem [shape: f32[2,1,16], index: 3, kind: input, shape index: {}]   ;;  %s1719_s4 = inlined_call_operand.vmem [shape: f32[1,16,1], index: 4, kind: input, shape index: {}]   ;;  %s1720_s5 = inlined_call_operand.hbm [shape: f32[128,128], index: 5, kind: input, shape index: {}]   ;;  %s1721_s6 = inlined_call_operand.vmem [shape: f32[1,128], index: 6, kind: input, shape index: {}]   ;;  %s1722_s7 = inlined_call_operand.hbm [shape: f32[128,128], index: 7, kind: input, shape index: {}]   ;;  %s1723_s8 = inlined_call_operand.vmem [shape: f32[1,128], index: 8, kind: input, shape index: {}]   ;;  %s1724_s9 = inlined_call_operand.hbm [shape: f32[2,1,128], index: 9, kind: output, shape index: {}]  }
   0x1   :  { %16 = vsyncpa [#allocation3 + $0x1], 0 }
   0x2   :  { %17 = vsyncpa [#allocation6], 0 }
   0x3   :  { %18 = vsyncpa [#allocation4], 0 }
   0x4   :  { %20 = vsyncpa [#allocation4 + $0x1], 0  ;;  %s1387_s30 = smov 0   ;;  %s1389_s10 = smov 0  }
   0x5   :  { %s1391_s11 = smov 0   ;;  %s1393_s12 = smov 0  }
   0x6 LB: > { %s1408_s13 = sadd.s32 4294967295, %s1325_s12   ;;  %s970_s14 = sadd.s32 4294967294, %s1325_s12   ;;  %s1325_s12 = sphi %s1393_s12, %s1751_s12   ;;  %s1321_s11 = sphi %s1391_s11, %s1750_s11   ;;  %s1317_s10 = sphi %s1389_s10, %s1749_s10   ;;  %s1313_s30 = sphi %s1387_s30, %s1748_s30  }
   0x7   : > { %p72_p0 = scmp.ne.s32.totalorder %s1317_s10, %s1313_s30  ;;  %p1725_p1 = scmp.eq.s32.totalorder %s1408_s13, 0 }
   0x8   : > { %p259_p3 = scmp.eq.s32.totalorder %s970_s14, 1  ;;  %p971_p5 = scmp.ge.s32.totalorder %s1325_s12, 1 }
   0x9   : > { %p1417_p4 = por %p1725_p1, %p72_p0  ;;  %p266_p7 = scmp.lt.s32.totalorder %s1325_s12, 3 }
   0xa   : > { %p1422_p6 = por %p259_p3, %p72_p0  ;;  %s1327_s18 = smov [#allocation5]  }
   0xb   : > { %s1731_s15 = scalar_select %p1417_p4, 1, 0 }
   0xc   : > { %s1732_s16 = scalar_select %p1422_p6, 1, 0 }
   0xd   : > { %p1427_p8 = pnand %p971_p5, %p266_p7  ;;  %s281_s19 = sshll.u32 %s1327_s18, 4  ;;  %s1431_s19 = int_to_ptr.vmem [resolvable:$true] %s281_s19 }
   0xe   : > { %1733 = sst [smem:[#allocation12_spill]] %s1732_s16  ;;  %s1328_s21 = smov [#allocation7]  }
   0xf   : > { %p1096_p9 = pneg %p1427_p8  ;;  %s297_s22 = sshll.u32 %s1328_s21, 4  ;;  %s1442_s22 = int_to_ptr.vmem [resolvable:$true] %s297_s22 }
  0x10   : > { %s1169_s25 = scalar_lea.hbm %s1720_s5, 2048 }
  0x11   : > { %p1438_p11 = pnand %p1096_p9, %p1725_p1  ;;  %p1170_p12 = scmp.ne.s32.totalorder %s1720_s5, %s1169_s25 }
  0x12   : > { %p1176_p5 = scmp.lt.u32.totalorder %s1169_s25, %s1720_s5 }
  0x13   : > { %p1171_p13 = pneg %p1438_p11 }
  0x15   : > { %p1172_p0 = pnand %p1171_p13, %p1170_p12 }
  0x17   : > { %p1173_p3 = pneg %p1172_p0 }
  0x19   : > { %p1178_p7 = pnand %p1176_p5, %p1173_p3 }
  0x1b   : > { %1181 = shalt.err (!%p1178_p7)
}
  0x1c   : > { %s1182_s14 = scalar_lea.vmem %s1431_s19, 2048  ;;  %p1190_p2 = scmp.lt.s32.totalorder %s1431_s19, %s1431_s19 }
  0x1d   : > { %p1183_p9 = scmp.ne.s32.totalorder %s1431_s19, %s1182_s14  ;;  %p1191_p12 = scmp.lt.s32.totalorder %s1182_s14, %s1182_s14 }
  0x1f   : > { %p1185_p10 = pnand %p1183_p9, %p1171_p13  ;;  %p1192_p0 = por %p1191_p12, %p1190_p2 }
  0x21   : > { %p1186_p1 = pneg %p1185_p10 }
  0x23   : > { %p1193_p6 = pnand %p1192_p0, %p1186_p1 }
  0x25   : > { %1196 = shalt.err (!%p1193_p6)
}
  0x26   : > { %s1727_s18 = smov 128   ;;  %s1728_s21 = smov 8  }
  0x27   : > { %1099 = dma.hbm_to_vmem [thread:$0]  (!%p1438_p11), %s1720_s5, 2048, %s1431_s19, [#allocation6], %s1727_s18, %s1727_s18, %s1728_s21  }
  0x28   : > { %s1197_s27 = scalar_lea.hbm %s1722_s7, 2048 }
  0x29   : > { %p1198_p1 = scmp.ne.s32.totalorder %s1722_s7, %s1197_s27  ;;  %p1204_p10 = scmp.lt.u32.totalorder %s1197_s27, %s1722_s7 }
  0x2b   : > { %p1200_p2 = pnand %p1198_p1, %p1171_p13 }
  0x2d   : > { %p1201_p6 = pneg %p1200_p2 }
  0x2f   : > { %p1206_p3 = pnand %p1204_p10, %p1201_p6 }
  0x31   : > { %1209 = shalt.err (!%p1206_p3)
}
  0x32   : > { %s1210_s19 = scalar_lea.vmem %s1442_s22, 2048  ;;  %p1218_p12 = scmp.lt.s32.totalorder %s1442_s22, %s1442_s22 }
  0x33   : > { %p1211_p5 = scmp.ne.s32.totalorder %s1442_s22, %s1210_s19  ;;  %p1219_p0 = scmp.lt.s32.totalorder %s1210_s19, %s1210_s19 }
  0x35   : > { %p1213_p7 = pnand %p1211_p5, %p1171_p13  ;;  %p1220_p1 = por %p1219_p0, %p1218_p12 }
  0x37   : > { %p1214_p9 = pneg %p1213_p7 }
  0x39   : > { %p1221_p2 = pnand %p1220_p1, %p1214_p9 }
  0x3b   : > { %1224 = shalt.err (!%p1221_p2)
}
  0x3c   : > { %1102 = dma.hbm_to_vmem [thread:$0]  (!%p1438_p11), %s1722_s7, 2048, %s1442_s22, [#allocation6], %s1727_s18, %s1727_s18, %s1728_s21  }
  0x3d   : > { %s1503_s20 = sadd.s32 1, %s1325_s12   ;;  %s59_s24 = sadd.s32 1, %s1321_s11 }
  0x3e   : > { %s56_s25 = ssub.s32 %s1325_s12, %s1503_s20  ;;  %p66_p13 = scmp.ne.s32.totalorder %s1321_s11, %s1317_s10 }
  0x3f   : > { %p57_p6 = scmp.eq.s32.totalorder %s56_s25, 0  ;;  %p67_p10 = scmp.eq.s32.totalorder %s1325_s12, 0 }
  0x40   : > { %p1736_p3 = scmp.eq.s32.totalorder %s1408_s13, 1  ;;  %p1113_p7 = scmp.lt.s32.totalorder %s1325_s12, 2 }
  0x41   : > { %s1519_s27 = scalar_select %p57_p6, %s1321_s11, %s59_s24  }
  0x42   : > { %p1513_p5 = por %p1736_p3, %p66_p13  ;;  %p68_p9 = por %p67_p10, %p66_p13 }
  0x43   : > { %s322_s28 = sand.u32 1, %s1321_s11   ;;  %s994_s22 = sshll.u32 %s1325_s12, 8 }
  0x44   : > { %s1737_s26 = scalar_select %p1513_p5, 1, 0 }
  0x45   : > { %s975_s29 = sshll.u32 %s322_s28, 4  ;;  %s1526_s16 = scalar_lea.hbm %s1716_s1, %s994_s22 }
  0x46   : > { %s326_s23 = scalar_lea.vmem [#allocation2], %s975_s29  ;;  %p1530_p11 = pnand %p1113_p7, %p68_p9 }
  0x47   : > { %s333_s25 = sshll.u32 %s326_s23, 4  ;;  %s1534_s18 = scalar_lea.sflag [#allocation3], %s322_s28  ;;  %s1528_s25 = int_to_ptr.vmem [resolvable:$true] %s333_s25 }
  0x48   : > { %s1225_s21 = scalar_lea.hbm %s1526_s16, 256  ;;  %p1227_p0 = pneg %p1530_p11 }
  0x49   : > { %p1226_p12 = scmp.ne.s32.totalorder %s1526_s16, %s1225_s21  ;;  %s1230_s14 = scalar_lea.hbm %s1716_s1, 512 }
  0x4a   : > { %p1231_p13 = scmp.lt.u32.totalorder %s1526_s16, %s1716_s1  ;;  %p1232_p6 = scmp.lt.u32.totalorder %s1230_s14, %s1225_s21 }
  0x4b   : > { %p1228_p1 = pnand %p1227_p0, %p1226_p12  ;;  %p1234_p3 = scmp.lt.u32.totalorder %s1225_s21, %s1526_s16 }
  0x4c   : > { %p1233_p10 = por %p1232_p6, %p1231_p13 }
  0x4d   : > { %p1229_p2 = pneg %p1228_p1 }
  0x4e   : > { %p1235_p7 = por %p1234_p3, %p1233_p10 }
  0x50   : > { %p1236_p9 = pnand %p1235_p7, %p1229_p2 }
  0x52   : > { %1239 = shalt.err (!%p1236_p9)
}
  0x53   : > { %s1240_s28 = scalar_lea.vmem %s1528_s25, 256  ;;  %s1331_s29 = smov [#allocation2]  }
  0x54   : > { %p1241_p12 = scmp.ne.s32.totalorder %s1528_s25, %s1240_s28  ;;  %s1245_s22 = sshll.u32 %s1331_s29, 4  ;;  %s1246_s22 = int_to_ptr.vmem [resolvable:$false] %s1245_s22 }
  0x55   : > { %s1247_s19 = scalar_lea.vmem %s1246_s22, 512  ;;  %p1248_p4 = scmp.lt.s32.totalorder %s1528_s25, %s1246_s22 }
  0x56   : > { %p1243_p1 = pnand %p1241_p12, %p1227_p0  ;;  %p1249_p13 = scmp.lt.s32.totalorder %s1247_s19, %s1240_s28 }
  0x58   : > { %p1244_p5 = pneg %p1243_p1  ;;  %p1250_p6 = por %p1249_p13, %p1248_p4 }
  0x5a   : > { %p1251_p10 = pnand %p1250_p6, %p1244_p5 }
  0x5c   : > { %1254 = shalt.err (!%p1251_p10)
}
  0x5d   : > { %s1739_s21 = smov 8   ;;  %s1740_s14 = smov 128  }
  0x5e   : > { %1106 = dma.hbm_to_vmem [thread:$0]  (!%p1530_p11), %s1526_s16, 256, %s1528_s25, %s1534_s18, %s1740_s14, %s1740_s14, %s1739_s21  }
  0x5f   : > { %359 = sbr.rel (%p1427_p8) target bundleno = 1712 (0x6b0), region = 56  ;;  %s1568_s23 = sand.u32 (!%p1427_p8), 1, %s1317_s10  }
  0x60   : > { %s979_s28 = sshll.u32 (!%p1427_p8), %s1568_s23, 4  ;;  %s362_s29 = scalar_lea.sflag (!%p1427_p8), [#allocation3], %s1568_s23 }
  0x61   : > { %s1572_s22 = scalar_lea.vmem (!%p1427_p8), [#allocation2], %s979_s28  ;;  %p1741_p4 = scmp.ne.s32.totalorder (!%p1427_p8), %s1731_s15, 0 }
  0x66   : > { %1300 = dma.done.wait (%p1741_p4), %s362_s29, 256  }
  0x67   : > { %1302 = vsyncadd (%p1741_p4), %s362_s29, 4294967040  ;;  %p1742_p5 = scmp.eq.s32.totalorder %s1408_s13, 0 }
  0x69   : > { %1304 = dma.done.wait (%p1742_p5), [#allocation6], 4096   ;;  %p1743_p8 = pmov %p1742_p5 }
  0x6a   : > { %p420_p11 = scmp.lt.s32.totalorder %s1408_s13, 1  ;;  %v1332_v0 = vmov 0   ;;  %v1333_v1 = vmov 0.0   ;;  %v443_v3 = vld [vmem:[#allocation5] sm:$0xff]  ;;  %v444_v4 = vld [vmem:[#allocation5 + $0x8] sm:$0xff]  ;;  %v445_v5 = vld [vmem:[#allocation5 + $0x10] sm:$0xff] }
  0x6b   : > { %1306 = vsyncadd (%p1743_p8), [#allocation6], 4294963200  ;;  %1157 = vset.pattern.permute.xlu0 %v1332_v0  ;;  %1022 = vmatprep.subr.bf16.mxu0 %v1333_v1  ;;  %v446_v6 = vld [vmem:[#allocation5 + $0x18] sm:$0xff]  ;;  %v459_v8 = vpack.c.bf16 %v444_v4, %v443_v3  ;;  %v447_v10 = vld [vmem:[#allocation5 + $0x20] sm:$0xff]  ;;  %vm1334_vm0 = vmmov 0   ;;  %vm493_vm1 = vcmask 130048  }
  0x6c   : > { %s1585_s17 = scalar_select %p420_p11, %s1408_s13, 1  ;;  %1042 = vmatprep.subr.bf16.mxu1 %v1333_v1  ;;  %1158 = vset.pattern.permute.xlu1 %v1332_v0  ;;  %v460_v9 = vpack.c.bf16 %v446_v6, %v445_v5  ;;  %v448_v11 = vld [vmem:[#allocation5 + $0x28] sm:$0xff]  ;;  %v449_v13 = vld [vmem:[#allocation5 + $0x30] sm:$0xff]  ;;  %v450_v14 = vld [vmem:[#allocation5 + $0x38] sm:$0xff]  ;;  %vm806_vm2 = vcmask 7168  }
  0x6d   : > { %1023 = vmatpush3.bf16.msra.mxu0 %v459_v8  ;;  %v461_v12 = vpack.c.bf16 %v448_v11, %v447_v10  ;;  %1038 = vmatprep.mubr.msk.bf16.mxu0 %vm1334_vm0, %v1333_v1  ;;  %v436_v15 = vld [vmem:[%s1572_s22] sm:$0xff]  ;;  %v437_v16 = vld [vmem:[%s1572_s22 + $0x8] sm:$0xff]  ;;  %v462_v18 = vpack.c.bf16 %v450_v14, %v449_v13  ;;  %s419_s14 = scalar_lea.vmem [#allocation8], %s1568_s23  ;;  %s840_s18 = scalar_lea.sflag [#allocation4], %s1568_s23 }
  0x6e   : > { %s995_s15 = sshll.u32 %s1585_s17, 4  ;;  %1024 = vmatprep.subr.bf16.mxu0 %v1333_v1  ;;  %1044 = vmatprep.mubr.msk.bf16.mxu1 %vm1334_vm0, %v1333_v1  ;;  %v494_v17 = vsel %vm493_vm1, %v436_v15, 0.0  ;;  %v497_v19 = vsel %vm493_vm1, %v437_v16, 0.0  ;;  %v451_v20 = vld [vmem:[#allocation5 + $0x40] sm:$0xff]  ;;  %v452_v21 = vld [vmem:[#allocation5 + $0x48] sm:$0xff]  ;;  %v453_v23 = vld [vmem:[#allocation5 + $0x50] sm:$0xff]  ;;  %s432_s16 = scalar_lea.vmem %s1718_s3, %s1585_s17 }
  0x6f   : > { %s429_s25 = scalar_lea.vmem %s1717_s2, %s995_s15  ;;  %495 = vadd.xlane.f32.xlu1 %v494_v17  ;;  %v463_v22 = vpack.c.bf16 %v452_v21, %v451_v20  ;;  %v454_v24 = vld [vmem:[#allocation5 + $0x58] sm:$0xff]  ;;  %v455_v26 = vld [vmem:[#allocation5 + $0x60] sm:$0xff]  ;;  %v456_v27 = vld [vmem:[#allocation5 + $0x68] sm:$0xff]  ;;  %s424_s21 = scalar_lea.vmem %s1715_s0, %s995_s15 }
  0x70   : > { %v438_v2 = vld [vmem:[%s429_s25] sm:$0xff]  ;;  %v439_v7 = vld [vmem:[%s429_s25 + $0x8] sm:$0xff]  ;;  %v464_v25 = vpack.c.bf16 %v454_v24, %v453_v23  ;;  %v465_v28 = vpack.c.bf16 %v456_v27, %v455_v26  ;;  %v457_v29 = vld [vmem:[#allocation5 + $0x70] sm:$0xff]  ;;  %s852_s28 = sshll.u32 %s419_s14, 4  ;;  %p1744_p2 = scmp.ne.s32.totalorder %s1737_s26, 0  ;;  %s1673_s28 = int_to_ptr.vmem [resolvable:$true] %s852_s28 }
  0x71   : > { %509 = vperm.xlu0 %1157, %v438_v2   ;;  %1025 = vmatpush3.bf16.msra.mxu0 %v460_v9  ;;  %v458_v30 = vld [vmem:[#allocation5 + $0x78] sm:$0xff]  ;;  %v1617_v33 = vld [vmem:[%s424_s21] sm:$0xff]  ;;  %v1619_v34 = vld [vmem:[%s424_s21 + $0x8] sm:$0xff]  ;;  %s991_s21 = sshll.u32 %s1408_s13, 4  ;;  %s1336_s13 = smov [#allocation8]  }
  0x72   : > { %1026 = vmatprep.subr.bf16.mxu0 %v1333_v1  ;;  %v466_v31 = vpack.c.bf16 %v458_v30, %v457_v29  ;;  %v468_v50 = vld [vmem:[#allocation7] sm:$0xff]  ;;  %v469_v51 = vld [vmem:[#allocation7 + $0x8] sm:$0xff]  ;;  %v470_v56 = vld [vmem:[#allocation7 + $0x10] sm:$0xff]  ;;  %s1671_s15 = scalar_lea.hbm %s1724_s9, %s991_s21  ;;  %s1259_s17 = sshll.u32 %s1336_s13, 4  ;;  %s1260_s17 = int_to_ptr.vmem [resolvable:$false] %s1259_s17 }
  0x73   : > { %498 = vadd.xlane.f32.xlu1 %v497_v19  ;;  %v484_v54 = vpack.c.bf16 %v469_v51, %v468_v50  ;;  %v471_v57 = vld [vmem:[#allocation7 + $0x18] sm:$0xff]  ;;  %v472_v59 = vld [vmem:[#allocation7 + $0x20] sm:$0xff]  ;;  %v473_v60 = vld [vmem:[#allocation7 + $0x28] sm:$0xff]  ;;  %s1261_s25 = scalar_lea.vmem %s1260_s17, 32  ;;  %p1262_p9 = scmp.lt.s32.totalorder %s1673_s28, %s1260_s17 }
  0x74   : > { %v485_v58 = vpack.c.bf16 %v471_v57, %v470_v56  ;;  %v486_v61 = vpack.c.bf16 %v473_v60, %v472_v59  ;;  %v474_v62 = vld [vmem:[#allocation7 + $0x30] sm:$0xff]  ;;  %v475_v63 = vld [vmem:[#allocation7 + $0x38] sm:$0xff]  ;;  %v476_v2 = vld [vmem:[#allocation7 + $0x40] sm:$0xff] }
  0x75   : > { %514 = vperm.xlu0 %1157, %v439_v7   ;;  %1027 = vmatpush3.bf16.msra.mxu0 %v461_v12  ;;  %v487_v0 = vpack.c.bf16 %v475_v63, %v474_v62  ;;  %v477_v3 = vld [vmem:[#allocation7 + $0x48] sm:$0xff]  ;;  %v478_v5 = vld [vmem:[#allocation7 + $0x50] sm:$0xff]  ;;  %v479_v6 = vld [vmem:[#allocation7 + $0x58] sm:$0xff] }
  0x76   : > { %1028 = vmatprep.subr.bf16.mxu0 %v1333_v1  ;;  %v488_v4 = vpack.c.bf16 %v477_v3, %v476_v2  ;;  %v489_v7 = vpack.c.bf16 %v479_v6, %v478_v5  ;;  %v480_v8 = vld [vmem:[#allocation7 + $0x60] sm:$0xff]  ;;  %v481_v9 = vld [vmem:[#allocation7 + $0x68] sm:$0xff]  ;;  %v482_v11 = vld [vmem:[#allocation7 + $0x70] sm:$0xff] }
  0x77   : > { %v490_v10 = vpack.c.bf16 %v481_v9, %v480_v8  ;;  %v483_v12 = vld [vmem:[#allocation7 + $0x78] sm:$0xff]  ;;  %v986_v14 = vld [vmem:[%s1721_s6] ss:$0 sm:$0xff]  ;;  %v442_v3 = vld [vmem:[%s1719_s4 + $0x8] sm:$0xff] }
  0x78   : > { %v491_v13 = vpack.c.bf16 %v483_v12, %v482_v11  ;;  %v441_v2 = vld [vmem:[%s1719_s4] sm:$0xff] }
  0x79   : > { %1029 = vmatpush3.bf16.msra.mxu0 %v462_v18 }
  0x7a   : > { %1030 = vmatprep.subr.bf16.mxu0 %v1333_v1 }
  0x7d   : > { %1031 = vmatpush3.bf16.msra.mxu0 %v463_v22 }
  0x7e   : > { %1032 = vmatprep.subr.bf16.mxu0 %v1333_v1 }
  0x81   : > { %1033 = vmatpush3.bf16.msra.mxu0 %v464_v25 }
  0x82   : > { %1034 = vmatprep.subr.bf16.mxu0 %v1333_v1 }
  0x85   : > { %1035 = vmatpush3.bf16.msra.mxu0 %v465_v28 }
  0x86   : > { %1036 = vmatprep.subr.bf16.mxu0 %v1333_v1 }
  0x89   : > { %1037 = vmatpush3.bf16.msra.mxu0 %v466_v31  ;;  %v1335_v31 = vmov 0.0|0.0  }
  0x8a   : > { %1068 = vmatprep.subr.bf16.mxu0 %v1333_v1 }
  0xf0   : > { %v1615_v32 = vpop.permute.xlu0 %509 }
  0xf1   : > { %v517_v36 = vmul.f32 %v1615_v32, %v1617_v33 }
  0xf4   : > { %v1621_v35 = vpop.permute.xlu0 %514 }
  0xf5   : > { %v518_v37 = vmul.f32 %v1621_v35, %v1619_v34 }
  0xf7   : > { %v519_v38 = vpack.c.bf16 %v518_v37, %v517_v36 }
  0xf9   : > { %1039 = vmatmul.mubr.bf16.vlgmr.msra.gmra.mrb[0].mxu0 %v519_v38 }
  0xfa   : > { %1070 = vmatprep.mubr.msk.bf16.mxu0 %vm1334_vm0, %v1333_v1 }
  0xfc   : > { %v496_v39 = vpop.xlane.xlu1 %495 }
  0xfd   : > { %v500_v41 = vadd.f32 1.0, %v496_v39 }
  0xff   : > { %1159 = vrcp.f32 %v500_v41 }
 0x100   : > { %v499_v40 = vpop.xlane.xlu1 %498 }
 0x101   : > { %v501_v42 = vadd.f32 1.0, %v499_v40 }
 0x103   : > { %1161 = vrcp.f32 %v501_v42 }
 0x109   : > { %v1160_v43 = vpop.eup %1159 }
 0x10a   : > { %v504_v48 = vmul.f32 %v1160_v43, %v436_v15  ;;  %v440_v43 = vld [vmem:[%s432_s16] sm:$0x1]  ;;  %s1255_s16 = scalar_lea.vmem %s1673_s28, 16 }
 0x10b   : > { %p1256_p0 = scmp.ne.s32.totalorder %s1673_s28, %s1255_s16  ;;  %p1263_p12 = scmp.lt.s32.totalorder %s1261_s25, %s1255_s16 }
 0x10d   : > { %v1162_v44 = vpop.eup %1161  ;;  %p1257_p3 = pnand %p1256_p0, %p1744_p2  ;;  %p1264_p1 = por %p1263_p12, %p1262_p9 }
 0x10e   : > { %v505_v49 = vmul.f32 %v1162_v44, %v437_v16  ;;  %v781_v44 = vlaneseq }
 0x10f   : > { %p1258_p7 = pneg %p1257_p3 }
 0x110   : > { %v506_v55 = vpack.c.bf16 %v505_v49, %v504_v48 }
 0x111   : > { %p1265_p13 = pnand %p1264_p1, %p1258_p7 }
 0x1cc   : > { %v554_v45 = vpop.f32.mrb[0].mxu0 }
 0x1cd   : > { %v1040_v46 = vpop.f32.mrb[1].mxu0 }
 0x1ce   : > { %v557_v47 = vpop.f32.mrb[2].mxu0 }
 0x1cf   : > { %v561_v52 = vpack.c.bf16 %v557_v47, %v554_v45  ;;  %v1041_v53 = vpop.f32.mrb[3].mxu0  ;;  %v782_v45 = vshrl.u32 %v781_v44, 7 }
 0x1d1   : > { %1043 = vmatpush3.bf16.msra.mxu1 %v561_v52  ;;  %v783_v46 = vsub.s32 0, %v782_v45 }
 0x1d2   : > { %1048 = vmatprep.subr.bf16.mxu1 %v1333_v1 }
 0x1d4   : > { %1045 = vmatmul.mubr.msk.bf16.vlgmr.msra.gmra.mrb[0].mxu1 %vm493_vm1, %v506_v55 }
 0x1d5   : > { %1049 = vmatpush3.bf16.msra.mxu1 %v484_v54  ;;  %1064 = vmatprep.mubr.msk.bf16.mxu1 %vm1334_vm0, %v1333_v1 }
 0x1d6   : > { %1050 = vmatprep.subr.bf16.mxu1 %v1333_v1 }
 0x1d9   : > { %1051 = vmatpush3.bf16.msra.mxu1 %v485_v58 }
 0x1da   : > { %1052 = vmatprep.subr.bf16.mxu1 %v1333_v1 }
 0x1dd   : > { %1053 = vmatpush3.bf16.msra.mxu1 %v486_v61 }
 0x1de   : > { %1054 = vmatprep.subr.bf16.mxu1 %v1333_v1 }
 0x1e1   : > { %1055 = vmatpush3.bf16.msra.mxu1 %v487_v0 }
 0x1e2   : > { %1056 = vmatprep.subr.bf16.mxu1 %v1333_v1 }
 0x1e5   : > { %1057 = vmatpush3.bf16.msra.mxu1 %v488_v4 }
 0x1e6   : > { %1058 = vmatprep.subr.bf16.mxu1 %v1333_v1 }
 0x1e9   : > { %1059 = vmatpush3.bf16.msra.mxu1 %v489_v7 }
 0x1ea   : > { %1060 = vmatprep.subr.bf16.mxu1 %v1333_v1 }
 0x1ed   : > { %1061 = vmatpush3.bf16.msra.mxu1 %v490_v10 }
 0x1ee   : > { %1062 = vmatprep.subr.bf16.mxu1 %v1333_v1 }
 0x1f1   : > { %1063 = vmatpush3.bf16.msra.mxu1 %v491_v13 }
 0x1f2   : > { %1081 = vmatprep.subr.bf16.mxu1 %v1335_v31 }
 0x2a7   : > { %v605_v15 = vpop.f32.mrb[0].mxu1 }
 0x2a8   : > { %v606_v16 = vadd.f32 %v986_v14, %v605_v15  ;;  %v1046_v17 = vpop.f32.mrb[1].mxu1 }
 0x2a9   : > { %v608_v18 = vpop.f32.mrb[2].mxu1 }
 0x2aa   : > { %v612_v19 = vmax.f32 %v606_v16, 0.0  ;;  %v609_v20 = vadd.f32 %v986_v14, %v608_v18  ;;  %v1047_v21 = vpop.f32.mrb[3].mxu1 }
 0x2ac   : > { %v613_v22 = vmax.f32 %v609_v20, 0.0  ;;  %v614_v23 = vmul.f32 %v612_v19, %v1615_v32  ;;  %v988_v32 = vld [vmem:[%s1723_s8] ss:$0 sm:$0xff] }
 0x2ae   : > { %v615_v24 = vmul.f32 %v613_v22, %v1621_v35 }
 0x2b0   : > { %v616_v25 = vpack.c.bf16 %v615_v24, %v614_v23 }
 0x2b2   : > { %1065 = vmatmul.mubr.bf16.vlgmr.msra.gmra.mrb[4].mxu1 %v616_v25 }
 0x2b3   : > { %1078 = vmatprep.mubr.msk.f32.mxu1 %vm1334_vm0, %v1333_v1 }
 0x385   : > { %v651_v26 = vpop.f32.mrb[4].mxu1 }
 0x386   : > { %v1066_v27 = vpop.f32.mrb[5].mxu1 }
 0x387   : > { %v654_v28 = vpop.f32.mrb[6].mxu1 }
 0x388   : > { %v658_v29 = vpack.c.bf16 %v654_v28, %v651_v26  ;;  %v1067_v30 = vpop.f32.mrb[7].mxu1 }
 0x38a   : > { %1069 = vmatpush3.bf16.msra.mxu0 %v658_v29 }
 0x38d   : > { %1071 = vmatmul.mubr.msk.bf16.vlgmr.msra.gmra.mrb[4].mxu0 %vm493_vm1, %v506_v55 }
 0x460   : > { %v699_v35 = vpop.f32.mrb[4].mxu0 }
 0x461   : > { %v700_v36 = vadd.f32 %v988_v32, %v699_v35  ;;  %v1072_v37 = vpop.f32.mrb[5].mxu0 }
 0x462   : > { %v702_v38 = vpop.f32.mrb[6].mxu0 }
 0x463   : > { %v703_v1 = vadd.f32 %v988_v32, %v702_v38  ;;  %v1073_v39 = vpop.f32.mrb[7].mxu0  ;;  %v706_v40 = vmax.f32 %v700_v36, 0.0 }
 0x465   : > { %v707_v41 = vmax.f32 %v703_v1, 0.0 }
 0x467   : > { %v1082_v42 = vpack.c.bf16 %v707_v41, %v706_v40 }
 0x469   : > { %1083 = vmatpush3.bf16.msra.mxu1 %v1082_v42 }
 0x46c   : > { %1079 = vmatmul.mubr.msk.f32.vlgmr.msra.gmra.mrb[8].mxu1 %vm493_vm1, %v440_v43 }
 0x53f   : > { %v777_v47 = vpop.f32.mrb[8].mxu1 }
 0x540   : > { %v784_v48 = vrot.slane %v777_v47, %v783_v46  ;;  %v1080_v49 = vpop.f32.mrb[9].mxu1 }
 0x542   : > { %v786_v50 = vmul.f32 %v784_v48, %v1619_v34  ;;  %v785_v51 = vmul.f32 %v784_v48, %v1617_v33 }
 0x544   : > { %789 = vadd.xlane.f32.xlu1 %v786_v50  ;;  %787 = vadd.xlane.f32.xlu0 %v785_v51 }
 0x5d1   : > { %v790_v52 = vpop.xlane.xlu1 %789  ;;  %v788_v53 = vpop.xlane.xlu0 %787 }
 0x5d2   : > { %v791_v54 = vmax.f32 %v788_v53, %v790_v52 }
 0x5d4   : > { %v792_v55 = vrot.slane %v791_v54, 4 }
 0x5d6   : > { %v793_v56 = vmax.f32 %v791_v54, %v792_v55 }
 0x5d8   : > { %v794_v57 = vrot.slane %v793_v56, 2 }
 0x5da   : > { %v795_v58 = vmax.f32 %v793_v56, %v794_v57 }
 0x5dc   : > { %v796_v59 = vrot.slane %v795_v58, 1 }
 0x5de   : > { %v797_v60 = vmax.f32 %v795_v58, %v796_v59 }
 0x5e0   : > { %v798_v61 = vsub.f32 %v788_v53, %v797_v60  ;;  %v799_v62 = vsub.f32 %v790_v52, %v797_v60 }
 0x5e2   : > { %v800_v63 = vmul.f32 1.442695, %v798_v61  ;;  %v802_v0 = vmul.f32 1.442695, %v799_v62 }
 0x5e4   : > { %1163 = vpow2.f32 %v800_v63 }
 0x5e5   : > { %1165 = vpow2.f32 %v802_v0 }
 0x5ee   : > { %v1164_v4 = vpop.eup %1163 }
 0x5ef   : > { %v1166_v5 = vpop.eup %1165  ;;  %v804_v6 = vmul.f32 %v1164_v4, %v441_v2 }
 0x5f0   : > { %v805_v7 = vmul.f32 %v1166_v5, %v442_v3 }
 0x5f1   : > { %v807_v8 = vsel %vm806_vm2, %v804_v6, 0.0 }
 0x5f2   : > { %v808_v9 = vsel %vm806_vm2, %v805_v7, 0.0 }
 0x5f3   : > { %v809_v10 = vadd.f32 %v808_v9, %v807_v8 }
 0x5f5   : > { %v810_v11 = vrot.slane %v809_v10, 4 }
 0x5f7   : > { %v811_v12 = vadd.f32 %v810_v11, %v809_v10 }
 0x5f9   : > { %v812_v13 = vrot.slane %v811_v12, 2 }
 0x5fb   : > { %v813_v14 = vadd.f32 %v812_v13, %v811_v12 }
 0x5fd   : > { %v814_v15 = vrot.slane %v813_v14, 1 }
 0x5ff   : > { %v815_v16 = vadd.f32 %v814_v15, %v813_v14 }
 0x601   : > { %1167 = vrcp.f32 %v815_v16 }
 0x60b   : > { %v1168_v17 = vpop.eup %1167 }
 0x60c   : > { %v817_v18 = vmul.f32 %v1168_v17, %v804_v6  ;;  %v818_v19 = vmul.f32 %v1168_v17, %v805_v7 }
 0x60e   : > { %821 = vperm.xlu1 %1158, %v817_v18  }
 0x612   : > { %826 = vperm.xlu1 %1158, %v818_v19  }
 0x68d   : > { %v822_v20 = vpop.permute.xlu1 %821 }
 0x68e   : > { %v829_v22 = vmul.f32 %v822_v20, %v1617_v33 }
 0x691   : > { %v827_v21 = vpop.permute.xlu1 %826 }
 0x692   : > { %v830_v23 = vmul.f32 %v827_v21, %v1619_v34 }
 0x694   : > { %v831_v24 = vadd.f32 %v830_v23, %v829_v22 }
 0x696   : > { %v832_v25 = vrot.slane %v831_v24, 4 }
 0x698   : > { %v833_v26 = vadd.f32 %v832_v25, %v831_v24 }
 0x69a   : > { %v834_v27 = vrot.slane %v833_v26, 2 }
 0x69c   : > { %v835_v28 = vadd.f32 %v834_v27, %v833_v26 }
 0x69e   : > { %v836_v29 = vrot.slane %v835_v28, 1 }
 0x6a0   : > { %v837_v30 = vadd.f32 %v836_v29, %v835_v28 }
 0x6a2   : > { %838 = vst [vmem:[%s419_s14] sm:$0x1] %v837_v30 }
 0x6a3   : > { %1268 = shalt.err (!%p1265_p13)
}
 0x6a4   : > { %s1269_s23 = scalar_lea.hbm %s1671_s15, 16  ;;  %s1273_s21 = scalar_lea.hbm %s1724_s9, 32 }
 0x6a5   : > { %p1270_p6 = scmp.ne.s32.totalorder %s1671_s15, %s1269_s23  ;;  %p1274_p5 = scmp.lt.u32.totalorder %s1671_s15, %s1724_s9 }
 0x6a6   : > { %p1275_p8 = scmp.lt.u32.totalorder %s1273_s21, %s1269_s23  ;;  %p1277_p0 = scmp.lt.u32.totalorder %s1269_s23, %s1671_s15 }
 0x6a7   : > { %p1271_p10 = pnand %p1270_p6, %p1744_p2 }
 0x6a8   : > { %p1276_p11 = por %p1275_p8, %p1274_p5 }
 0x6a9   : > { %p1272_p4 = pneg %p1271_p10 }
 0x6aa   : > { %p1278_p3 = por %p1277_p0, %p1276_p11 }
 0x6ac   : > { %p1279_p7 = pnand %p1278_p3, %p1272_p4 }
 0x6ae   : > { %1282 = shalt.err (!%p1279_p7)
}
 0x6af   : > { %1094 = dma.vmem_to_hbm [thread:$0]  (%p1744_p2), %s1673_s28, 16, %s1671_s15, %s840_s18  }
 0x6b0 PF: > { %s1745_s22 = sld [smem:[#allocation12_spill]]  ;;  %s864_s16 = sand.u32 1, %s1313_s30  }
 0x6b1   : > { %p1747_p12 = scmp.ge.s32.totalorder %s1325_s12, 2  ;;  %s865_s13 = scalar_lea.sflag [#allocation4], %s864_s16 }
 0x6b6   : > { %p1746_p9 = scmp.ne.s32.totalorder %s1745_s22, 0 }
 0x6b8   : > { %p1108_p1 = pnand %p1747_p12, %p1746_p9 }
 0x6ba   : > { %1308 = dma.done.wait (!%p1108_p1), %s865_s13, 16  }
 0x6bb   : > { %1310 = vsyncadd (!%p1108_p1), %s865_s13, 4294967280  ;;  %p23_p13 = scmp.ge.s32.totalorder %s1503_s20, 4   ;;  %s1748_s30 = smov %s1317_s10 }
 0x6bc   : > { %s1749_s10 = smov %s1321_s11  ;;  %s1750_s11 = smov %s1519_s27 }
 0x6bd   : > { %s1751_s12 = smov %s1503_s20  ;;  %25 = sbr.rel (!%p23_p13) target bundleno = 6 (0x6), region = 118 }
 0x6c4   :  { %869 = vsyncpa [#allocation3], 1 }
 0x6c5   :  { %871 = vsyncpa [#allocation3 + $0x1], 1 }
 0x6c6   :  { %872 = vsyncpa [#allocation6], 1 }
 0x6c7   :  { %873 = vsyncpa [#allocation4], 1 }
 0x6c8   :  { %875 = vsyncpa [#allocation4 + $0x1], 1 }

// kernel: tpu_custom_call.1
= control target key start
LH: loop header
LB: loop body
LE: loop exit
PB: predicated region body
PF: predicated region fallthrough
CT: control target
= control target key end

     0   :  { %14 = vsyncpa [#allocation3], 0  ;;  %s1715_s0 = inlined_call_operand.vmem [shape: f32[2,16,128], index: 0, kind: input, shape index: {}]   ;;  %s1716_s1 = inlined_call_operand.hbm [shape: f32[2,16,16], index: 1, kind: input, shape index: {}]   ;;  %s1717_s2 = inlined_call_operand.vmem [shape: f32[2,16,1], index: 2, kind: input, shape index: {}]   ;;  %s1718_s3 = inlined_call_operand.vmem [shape: f32[2,1,16], index: 3, kind: input, shape index: {}]   ;;  %s1719_s4 = inlined_call_operand.vmem [shape: f32[1,16,1], index: 4, kind: input, shape index: {}]   ;;  %s1720_s5 = inlined_call_operand.hbm [shape: f32[128,128], index: 5, kind: input, shape index: {}]   ;;  %s1721_s6 = inlined_call_operand.vmem [shape: f32[1,128], index: 6, kind: input, shape index: {}]   ;;  %s1722_s7 = inlined_call_operand.hbm [shape: f32[128,128], index: 7, kind: input, shape index: {}]   ;;  %s1723_s8 = inlined_call_operand.vmem [shape: f32[1,128], index: 8, kind: input, shape index: {}]   ;;  %s1724_s9 = inlined_call_operand.hbm [shape: f32[2,1,128], index: 9, kind: output, shape index: {}]  }
   0x1   :  { %16 = vsyncpa [#allocation3 + $0x1], 0 }
   0x2   :  { %17 = vsyncpa [#allocation6], 0 }
   0x3   :  { %18 = vsyncpa [#allocation4], 0 }
   0x4   :  { %20 = vsyncpa [#allocation4 + $0x1], 0  ;;  %s1387_s30 = smov 0   ;;  %s1389_s10 = smov 0  }
   0x5   :  { %s1391_s11 = smov 0   ;;  %s1393_s12 = smov 0  }
   0x6 LB: > { %s1408_s13 = sadd.s32 4294967295, %s1325_s12   ;;  %s970_s14 = sadd.s32 4294967294, %s1325_s12   ;;  %s1325_s12 = sphi %s1393_s12, %s1751_s12   ;;  %s1321_s11 = sphi %s1391_s11, %s1750_s11   ;;  %s1317_s10 = sphi %s1389_s10, %s1749_s10   ;;  %s1313_s30 = sphi %s1387_s30, %s1748_s30  }
   0x7   : > { %p72_p0 = scmp.ne.s32.totalorder %s1317_s10, %s1313_s30  ;;  %p1725_p1 = scmp.eq.s32.totalorder %s1408_s13, 0 }
   0x8   : > { %p259_p3 = scmp.eq.s32.totalorder %s970_s14, 1  ;;  %p971_p5 = scmp.ge.s32.totalorder %s1325_s12, 1 }
   0x9   : > { %p1417_p4 = por %p1725_p1, %p72_p0  ;;  %p266_p7 = scmp.lt.s32.totalorder %s1325_s12, 3 }
   0xa   : > { %p1422_p6 = por %p259_p3, %p72_p0  ;;  %s1327_s18 = smov [#allocation5]  }
   0xb   : > { %s1731_s15 = scalar_select %p1417_p4, 1, 0 }
   0xc   : > { %s1732_s16 = scalar_select %p1422_p6, 1, 0 }
   0xd   : > { %p1427_p8 = pnand %p971_p5, %p266_p7  ;;  %s281_s19 = sshll.u32 %s1327_s18, 4  ;;  %s1431_s19 = int_to_ptr.vmem [resolvable:$true] %s281_s19 }
   0xe   : > { %1733 = sst [smem:[#allocation12_spill]] %s1732_s16  ;;  %s1328_s21 = smov [#allocation7]  }
   0xf   : > { %p1096_p9 = pneg %p1427_p8  ;;  %s297_s22 = sshll.u32 %s1328_s21, 4  ;;  %s1442_s22 = int_to_ptr.vmem [resolvable:$true] %s297_s22 }
  0x10   : > { %s1169_s25 = scalar_lea.hbm %s1720_s5, 2048 }
  0x11   : > { %p1438_p11 = pnand %p1096_p9, %p1725_p1  ;;  %p1170_p12 = scmp.ne.s32.totalorder %s1720_s5, %s1169_s25 }
  0x12   : > { %p1176_p5 = scmp.lt.u32.totalorder %s1169_s25, %s1720_s5 }
  0x13   : > { %p1171_p13 = pneg %p1438_p11 }
  0x15   : > { %p1172_p0 = pnand %p1171_p13, %p1170_p12 }
  0x17   : > { %p1173_p3 = pneg %p1172_p0 }
  0x19   : > { %p1178_p7 = pnand %p1176_p5, %p1173_p3 }
  0x1b   : > { %1181 = shalt.err (!%p1178_p7)
}
  0x1c   : > { %s1182_s14 = scalar_lea.vmem %s1431_s19, 2048  ;;  %p1190_p2 = scmp.lt.s32.totalorder %s1431_s19, %s1431_s19 }
  0x1d   : > { %p1183_p9 = scmp.ne.s32.totalorder %s1431_s19, %s1182_s14  ;;  %p1191_p12 = scmp.lt.s32.totalorder %s1182_s14, %s1182_s14 }
  0x1f   : > { %p1185_p10 = pnand %p1183_p9, %p1171_p13  ;;  %p1192_p0 = por %p1191_p12, %p1190_p2 }
  0x21   : > { %p1186_p1 = pneg %p1185_p10 }
  0x23   : > { %p1193_p6 = pnand %p1192_p0, %p1186_p1 }
  0x25   : > { %1196 = shalt.err (!%p1193_p6)
}
  0x26   : > { %s1727_s18 = smov 128   ;;  %s1728_s21 = smov 8  }
  0x27   : > { %1099 = dma.hbm_to_vmem [thread:$0]  (!%p1438_p11), %s1720_s5, 2048, %s1431_s19, [#allocation6], %s1727_s18, %s1727_s18, %s1728_s21  }
  0x28   : > { %s1197_s27 = scalar_lea.hbm %s1722_s7, 2048 }
  0x29   : > { %p1198_p1 = scmp.ne.s32.totalorder %s1722_s7, %s1197_s27  ;;  %p1204_p10 = scmp.lt.u32.totalorder %s1197_s27, %s1722_s7 }
  0x2b   : > { %p1200_p2 = pnand %p1198_p1, %p1171_p13 }
  0x2d   : > { %p1201_p6 = pneg %p1200_p2 }
  0x2f   : > { %p1206_p3 = pnand %p1204_p10, %p1201_p6 }
  0x31   : > { %1209 = shalt.err (!%p1206_p3)
}
  0x32   : > { %s1210_s19 = scalar_lea.vmem %s1442_s22, 2048  ;;  %p1218_p12 = scmp.lt.s32.totalorder %s1442_s22, %s1442_s22 }
  0x33   : > { %p1211_p5 = scmp.ne.s32.totalorder %s1442_s22, %s1210_s19  ;;  %p1219_p0 = scmp.lt.s32.totalorder %s1210_s19, %s1210_s19 }
  0x35   : > { %p1213_p7 = pnand %p1211_p5, %p1171_p13  ;;  %p1220_p1 = por %p1219_p0, %p1218_p12 }
  0x37   : > { %p1214_p9 = pneg %p1213_p7 }
  0x39   : > { %p1221_p2 = pnand %p1220_p1, %p1214_p9 }
  0x3b   : > { %1224 = shalt.err (!%p1221_p2)
}
  0x3c   : > { %1102 = dma.hbm_to_vmem [thread:$0]  (!%p1438_p11), %s1722_s7, 2048, %s1442_s22, [#allocation6], %s1727_s18, %s1727_s18, %s1728_s21  }
  0x3d   : > { %s1503_s20 = sadd.s32 1, %s1325_s12   ;;  %s59_s24 = sadd.s32 1, %s1321_s11 }
  0x3e   : > { %s56_s25 = ssub.s32 %s1325_s12, %s1503_s20  ;;  %p66_p13 = scmp.ne.s32.totalorder %s1321_s11, %s1317_s10 }
  0x3f   : > { %p57_p6 = scmp.eq.s32.totalorder %s56_s25, 0  ;;  %p67_p10 = scmp.eq.s32.totalorder %s1325_s12, 0 }
  0x40   : > { %p1736_p3 = scmp.eq.s32.totalorder %s1408_s13, 1  ;;  %p1113_p7 = scmp.lt.s32.totalorder %s1325_s12, 2 }
  0x41   : > { %s1519_s27 = scalar_select %p57_p6, %s1321_s11, %s59_s24  }
  0x42   : > { %p1513_p5 = por %p1736_p3, %p66_p13  ;;  %p68_p9 = por %p67_p10, %p66_p13 }
  0x43   : > { %s322_s28 = sand.u32 1, %s1321_s11   ;;  %s994_s22 = sshll.u32 %s1325_s12, 8 }
  0x44   : > { %s1737_s26 = scalar_select %p1513_p5, 1, 0 }
  0x45   : > { %s975_s29 = sshll.u32 %s322_s28, 4  ;;  %s1526_s16 = scalar_lea.hbm %s1716_s1, %s994_s22 }
  0x46   : > { %s326_s23 = scalar_lea.vmem [#allocation2], %s975_s29  ;;  %p1530_p11 = pnand %p1113_p7, %p68_p9 }
  0x47   : > { %s333_s25 = sshll.u32 %s326_s23, 4  ;;  %s1534_s18 = scalar_lea.sflag [#allocation3], %s322_s28  ;;  %s1528_s25 = int_to_ptr.vmem [resolvable:$true] %s333_s25 }
  0x48   : > { %s1225_s21 = scalar_lea.hbm %s1526_s16, 256  ;;  %p1227_p0 = pneg %p1530_p11 }
  0x49   : > { %p1226_p12 = scmp.ne.s32.totalorder %s1526_s16, %s1225_s21  ;;  %s1230_s14 = scalar_lea.hbm %s1716_s1, 512 }
  0x4a   : > { %p1231_p13 = scmp.lt.u32.totalorder %s1526_s16, %s1716_s1  ;;  %p1232_p6 = scmp.lt.u32.totalorder %s1230_s14, %s1225_s21 }
  0x4b   : > { %p1228_p1 = pnand %p1227_p0, %p1226_p12  ;;  %p1234_p3 = scmp.lt.u32.totalorder %s1225_s21, %s1526_s16 }
  0x4c   : > { %p1233_p10 = por %p1232_p6, %p1231_p13 }
  0x4d   : > { %p1229_p2 = pneg %p1228_p1 }
  0x4e   : > { %p1235_p7 = por %p1234_p3, %p1233_p10 }
  0x50   : > { %p1236_p9 = pnand %p1235_p7, %p1229_p2 }
  0x52   : > { %1239 = shalt.err (!%p1236_p9)
}
  0x53   : > { %s1240_s28 = scalar_lea.vmem %s1528_s25, 256  ;;  %s1331_s29 = smov [#allocation2]  }
  0x54   : > { %p1241_p12 = scmp.ne.s32.totalorder %s1528_s25, %s1240_s28  ;;  %s1245_s22 = sshll.u32 %s1331_s29, 4  ;;  %s1246_s22 = int_to_ptr.vmem [resolvable:$false] %s1245_s22 }
  0x55   : > { %s1247_s19 = scalar_lea.vmem %s1246_s22, 512  ;;  %p1248_p4 = scmp.lt.s32.totalorder %s1528_s25, %s1246_s22 }
  0x56   : > { %p1243_p1 = pnand %p1241_p12, %p1227_p0  ;;  %p1249_p13 = scmp.lt.s32.totalorder %s1247_s19, %s1240_s28 }
  0x58   : > { %p1244_p5 = pneg %p1243_p1  ;;  %p1250_p6 = por %p1249_p13, %p1248_p4 }
  0x5a   : > { %p1251_p10 = pnand %p1250_p6, %p1244_p5 }
  0x5c   : > { %1254 = shalt.err (!%p1251_p10)
}
  0x5d   : > { %s1739_s21 = smov 8   ;;  %s1740_s14 = smov 128  }
  0x5e   : > { %1106 = dma.hbm_to_vmem [thread:$0]  (!%p1530_p11), %s1526_s16, 256, %s1528_s25, %s1534_s18, %s1740_s14, %s1740_s14, %s1739_s21  }
  0x5f   : > { %359 = sbr.rel (%p1427_p8) target bundleno = 1712 (0x6b0), region = 56  ;;  %s1568_s23 = sand.u32 (!%p1427_p8), 1, %s1317_s10  }
  0x60   : > { %s979_s28 = sshll.u32 (!%p1427_p8), %s1568_s23, 4  ;;  %s362_s29 = scalar_lea.sflag (!%p1427_p8), [#allocation3], %s1568_s23 }
  0x61   : > { %s1572_s22 = scalar_lea.vmem (!%p1427_p8), [#allocation2], %s979_s28  ;;  %p1741_p4 = scmp.ne.s32.totalorder (!%p1427_p8), %s1731_s15, 0 }
  0x66   : > { %1300 = dma.done.wait (%p1741_p4), %s362_s29, 256  }
  0x67   : > { %1302 = vsyncadd (%p1741_p4), %s362_s29, 4294967040  ;;  %p1742_p5 = scmp.eq.s32.totalorder %s1408_s13, 0 }
  0x69   : > { %1304 = dma.done.wait (%p1742_p5), [#allocation6], 4096   ;;  %p1743_p8 = pmov %p1742_p5 }
  0x6a   : > { %p420_p11 = scmp.lt.s32.totalorder %s1408_s13, 1  ;;  %v1332_v0 = vmov 0   ;;  %v1333_v1 = vmov 0.0   ;;  %v443_v3 = vld [vmem:[#allocation5] sm:$0xff]  ;;  %v444_v4 = vld [vmem:[#allocation5 + $0x8] sm:$0xff]  ;;  %v445_v5 = vld [vmem:[#allocation5 + $0x10] sm:$0xff] }
  0x6b   : > { %1306 = vsyncadd (%p1743_p8), [#allocation6], 4294963200  ;;  %1157 = vset.pattern.permute.xlu0 %v1332_v0  ;;  %1022 = vmatprep.subr.bf16.mxu0 %v1333_v1  ;;  %v446_v6 = vld [vmem:[#allocation5 + $0x18] sm:$0xff]  ;;  %v459_v8 = vpack.c.bf16 %v444_v4, %v443_v3  ;;  %v447_v10 = vld [vmem:[#allocation5 + $0x20] sm:$0xff]  ;;  %vm1334_vm0 = vmmov 0   ;;  %vm493_vm1 = vcmask 130048  }
  0x6c   : > { %s1585_s17 = scalar_select %p420_p11, %s1408_s13, 1  ;;  %1042 = vmatprep.subr.bf16.mxu1 %v1333_v1  ;;  %1158 = vset.pattern.permute.xlu1 %v1332_v0  ;;  %v460_v9 = vpack.c.bf16 %v446_v6, %v445_v5  ;;  %v448_v11 = vld [vmem:[#allocation5 + $0x28] sm:$0xff]  ;;  %v449_v13 = vld [vmem:[#allocation5 + $0x30] sm:$0xff]  ;;  %v450_v14 = vld [vmem:[#allocation5 + $0x38] sm:$0xff]  ;;  %vm806_vm2 = vcmask 7168  }
  0x6d   : > { %1023 = vmatpush3.bf16.msra.mxu0 %v459_v8  ;;  %v461_v12 = vpack.c.bf16 %v448_v11, %v447_v10  ;;  %1038 = vmatprep.mubr.msk.bf16.mxu0 %vm1334_vm0, %v1333_v1  ;;  %v436_v15 = vld [vmem:[%s1572_s22] sm:$0xff]  ;;  %v437_v16 = vld [vmem:[%s1572_s22 + $0x8] sm:$0xff]  ;;  %v462_v18 = vpack.c.bf16 %v450_v14, %v449_v13  ;;  %s419_s14 = scalar_lea.vmem [#allocation8], %s1568_s23  ;;  %s840_s18 = scalar_lea.sflag [#allocation4], %s1568_s23 }
  0x6e   : > { %s995_s15 = sshll.u32 %s1585_s17, 4  ;;  %1024 = vmatprep.subr.bf16.mxu0 %v1333_v1  ;;  %1044 = vmatprep.mubr.msk.bf16.mxu1 %vm1334_vm0, %v1333_v1  ;;  %v494_v17 = vsel %vm493_vm1, %v436_v15, 0.0  ;;  %v497_v19 = vsel %vm493_vm1, %v437_v16, 0.0  ;;  %v451_v20 = vld [vmem:[#allocation5 + $0x40] sm:$0xff]  ;;  %v452_v21 = vld [vmem:[#allocation5 + $0x48] sm:$0xff]  ;;  %v453_v23 = vld [vmem:[#allocation5 + $0x50] sm:$0xff]  ;;  %s432_s16 = scalar_lea.vmem %s1718_s3, %s1585_s17 }
  0x6f   : > { %s429_s25 = scalar_lea.vmem %s1717_s2, %s995_s15  ;;  %495 = vadd.xlane.f32.xlu1 %v494_v17  ;;  %v463_v22 = vpack.c.bf16 %v452_v21, %v451_v20  ;;  %v454_v24 = vld [vmem:[#allocation5 + $0x58] sm:$0xff]  ;;  %v455_v26 = vld [vmem:[#allocation5 + $0x60] sm:$0xff]  ;;  %v456_v27 = vld [vmem:[#allocation5 + $0x68] sm:$0xff]  ;;  %s424_s21 = scalar_lea.vmem %s1715_s0, %s995_s15 }
  0x70   : > { %v438_v2 = vld [vmem:[%s429_s25] sm:$0xff]  ;;  %v439_v7 = vld [vmem:[%s429_s25 + $0x8] sm:$0xff]  ;;  %v464_v25 = vpack.c.bf16 %v454_v24, %v453_v23  ;;  %v465_v28 = vpack.c.bf16 %v456_v27, %v455_v26  ;;  %v457_v29 = vld [vmem:[#allocation5 + $0x70] sm:$0xff]  ;;  %s852_s28 = sshll.u32 %s419_s14, 4  ;;  %p1744_p2 = scmp.ne.s32.totalorder %s1737_s26, 0  ;;  %s1673_s28 = int_to_ptr.vmem [resolvable:$true] %s852_s28 }
  0x71   : > { %509 = vperm.xlu0 %1157, %v438_v2   ;;  %1025 = vmatpush3.bf16.msra.mxu0 %v460_v9  ;;  %v458_v30 = vld [vmem:[#allocation5 + $0x78] sm:$0xff]  ;;  %v1617_v33 = vld [vmem:[%s424_s21] sm:$0xff]  ;;  %v1619_v34 = vld [vmem:[%s424_s21 + $0x8] sm:$0xff]  ;;  %s991_s21 = sshll.u32 %s1408_s13, 4  ;;  %s1336_s13 = smov [#allocation8]  }
  0x72   : > { %1026 = vmatprep.subr.bf16.mxu0 %v1333_v1  ;;  %v466_v31 = vpack.c.bf16 %v458_v30, %v457_v29  ;;  %v468_v50 = vld [vmem:[#allocation7] sm:$0xff]  ;;  %v469_v51 = vld [vmem:[#allocation7 + $0x8] sm:$0xff]  ;;  %v470_v56 = vld [vmem:[#allocation7 + $0x10] sm:$0xff]  ;;  %s1671_s15 = scalar_lea.hbm %s1724_s9, %s991_s21  ;;  %s1259_s17 = sshll.u32 %s1336_s13, 4  ;;  %s1260_s17 = int_to_ptr.vmem [resolvable:$false] %s1259_s17 }
  0x73   : > { %498 = vadd.xlane.f32.xlu1 %v497_v19  ;;  %v484_v54 = vpack.c.bf16 %v469_v51, %v468_v50  ;;  %v471_v57 = vld [vmem:[#allocation7 + $0x18] sm:$0xff]  ;;  %v472_v59 = vld [vmem:[#allocation7 + $0x20] sm:$0xff]  ;;  %v473_v60 = vld [vmem:[#allocation7 + $0x28] sm:$0xff]  ;;  %s1261_s25 = scalar_lea.vmem %s1260_s17, 32  ;;  %p1262_p9 = scmp.lt.s32.totalorder %s1673_s28, %s1260_s17 }
  0x74   : > { %v485_v58 = vpack.c.bf16 %v471_v57, %v470_v56  ;;  %v486_v61 = vpack.c.bf16 %v473_v60, %v472_v59  ;;  %v474_v62 = vld [vmem:[#allocation7 + $0x30] sm:$0xff]  ;;  %v475_v63 = vld [vmem:[#allocation7 + $0x38] sm:$0xff]  ;;  %v476_v2 = vld [vmem:[#allocation7 + $0x40] sm:$0xff] }
  0x75   : > { %514 = vperm.xlu0 %1157, %v439_v7   ;;  %1027 = vmatpush3.bf16.msra.mxu0 %v461_v12  ;;  %v487_v0 = vpack.c.bf16 %v475_v63, %v474_v62  ;;  %v477_v3 = vld [vmem:[#allocation7 + $0x48] sm:$0xff]  ;;  %v478_v5 = vld [vmem:[#allocation7 + $0x50] sm:$0xff]  ;;  %v479_v6 = vld [vmem:[#allocation7 + $0x58] sm:$0xff] }
  0x76   : > { %1028 = vmatprep.subr.bf16.mxu0 %v1333_v1  ;;  %v488_v4 = vpack.c.bf16 %v477_v3, %v476_v2  ;;  %v489_v7 = vpack.c.bf16 %v479_v6, %v478_v5  ;;  %v480_v8 = vld [vmem:[#allocation7 + $0x60] sm:$0xff]  ;;  %v481_v9 = vld [vmem:[#allocation7 + $0x68] sm:$0xff]  ;;  %v482_v11 = vld [vmem:[#allocation7 + $0x70] sm:$0xff] }
  0x77   : > { %v490_v10 = vpack.c.bf16 %v481_v9, %v480_v8  ;;  %v483_v12 = vld [vmem:[#allocation7 + $0x78] sm:$0xff]  ;;  %v986_v14 = vld [vmem:[%s1721_s6] ss:$0 sm:$0xff]  ;;  %v442_v3 = vld [vmem:[%s1719_s4 + $0x8] sm:$0xff] }
  0x78   : > { %v491_v13 = vpack.c.bf16 %v483_v12, %v482_v11  ;;  %v441_v2 = vld [vmem:[%s1719_s4] sm:$0xff] }
  0x79   : > { %1029 = vmatpush3.bf16.msra.mxu0 %v462_v18 }
  0x7a   : > { %1030 = vmatprep.subr.bf16.mxu0 %v1333_v1 }
  0x7d   : > { %1031 = vmatpush3.bf16.msra.mxu0 %v463_v22 }
  0x7e   : > { %1032 = vmatprep.subr.bf16.mxu0 %v1333_v1 }
  0x81   : > { %1033 = vmatpush3.bf16.msra.mxu0 %v464_v25 }
  0x82   : > { %1034 = vmatprep.subr.bf16.mxu0 %v1333_v1 }
  0x85   : > { %1035 = vmatpush3.bf16.msra.mxu0 %v465_v28 }
  0x86   : > { %1036 = vmatprep.subr.bf16.mxu0 %v1333_v1 }
  0x89   : > { %1037 = vmatpush3.bf16.msra.mxu0 %v466_v31  ;;  %v1335_v31 = vmov 0.0|0.0  }
  0x8a   : > { %1068 = vmatprep.subr.bf16.mxu0 %v1333_v1 }
  0xf0   : > { %v1615_v32 = vpop.permute.xlu0 %509 }
  0xf1   : > { %v517_v36 = vmul.f32 %v1615_v32, %v1617_v33 }
  0xf4   : > { %v1621_v35 = vpop.permute.xlu0 %514 }
  0xf5   : > { %v518_v37 = vmul.f32 %v1621_v35, %v1619_v34 }
  0xf7   : > { %v519_v38 = vpack.c.bf16 %v518_v37, %v517_v36 }
  0xf9   : > { %1039 = vmatmul.mubr.bf16.vlgmr.msra.gmra.mrb[0].mxu0 %v519_v38 }
  0xfa   : > { %1070 = vmatprep.mubr.msk.bf16.mxu0 %vm1334_vm0, %v1333_v1 }
  0xfc   : > { %v496_v39 = vpop.xlane.xlu1 %495 }
  0xfd   : > { %v500_v41 = vadd.f32 1.0, %v496_v39 }
  0xff   : > { %1159 = vrcp.f32 %v500_v41 }
 0x100   : > { %v499_v40 = vpop.xlane.xlu1 %498 }
 0x101   : > { %v501_v42 = vadd.f32 1.0, %v499_v40 }
 0x103   : > { %1161 = vrcp.f32 %v501_v42 }
 0x109   : > { %v1160_v43 = vpop.eup %1159 }
 0x10a   : > { %v504_v48 = vmul.f32 %v1160_v43, %v436_v15  ;;  %v440_v43 = vld [vmem:[%s432_s16] sm:$0x1]  ;;  %s1255_s16 = scalar_lea.vmem %s1673_s28, 16 }
 0x10b   : > { %p1256_p0 = scmp.ne.s32.totalorder %s1673_s28, %s1255_s16  ;;  %p1263_p12 = scmp.lt.s32.totalorder %s1261_s25, %s1255_s16 }
 0x10d   : > { %v1162_v44 = vpop.eup %1161  ;;  %p1257_p3 = pnand %p1256_p0, %p1744_p2  ;;  %p1264_p1 = por %p1263_p12, %p1262_p9 }
 0x10e   : > { %v505_v49 = vmul.f32 %v1162_v44, %v437_v16  ;;  %v781_v44 = vlaneseq }
 0x10f   : > { %p1258_p7 = pneg %p1257_p3 }
 0x110   : > { %v506_v55 = vpack.c.bf16 %v505_v49, %v504_v48 }
 0x111   : > { %p1265_p13 = pnand %p1264_p1, %p1258_p7 }
 0x1cc   : > { %v554_v45 = vpop.f32.mrb[0].mxu0 }
 0x1cd   : > { %v1040_v46 = vpop.f32.mrb[1].mxu0 }
 0x1ce   : > { %v557_v47 = vpop.f32.mrb[2].mxu0 }
 0x1cf   : > { %v561_v52 = vpack.c.bf16 %v557_v47, %v554_v45  ;;  %v1041_v53 = vpop.f32.mrb[3].mxu0  ;;  %v782_v45 = vshrl.u32 %v781_v44, 7 }
 0x1d1   : > { %1043 = vmatpush3.bf16.msra.mxu1 %v561_v52  ;;  %v783_v46 = vsub.s32 0, %v782_v45 }
 0x1d2   : > { %1048 = vmatprep.subr.bf16.mxu1 %v1333_v1 }
 0x1d4   : > { %1045 = vmatmul.mubr.msk.bf16.vlgmr.msra.gmra.mrb[0].mxu1 %vm493_vm1, %v506_v55 }
 0x1d5   : > { %1049 = vmatpush3.bf16.msra.mxu1 %v484_v54  ;;  %1064 = vmatprep.mubr.msk.bf16.mxu1 %vm1334_vm0, %v1333_v1 }
 0x1d6   : > { %1050 = vmatprep.subr.bf16.mxu1 %v1333_v1 }
 0x1d9   : > { %1051 = vmatpush3.bf16.msra.mxu1 %v485_v58 }
 0x1da   : > { %1052 = vmatprep.subr.bf16.mxu1 %v1333_v1 }
 0x1dd   : > { %1053 = vmatpush3.bf16.msra.mxu1 %v486_v61 }
 0x1de   : > { %1054 = vmatprep.subr.bf16.mxu1 %v1333_v1 }
 0x1e1   : > { %1055 = vmatpush3.bf16.msra.mxu1 %v487_v0 }
 0x1e2   : > { %1056 = vmatprep.subr.bf16.mxu1 %v1333_v1 }
 0x1e5   : > { %1057 = vmatpush3.bf16.msra.mxu1 %v488_v4 }
 0x1e6   : > { %1058 = vmatprep.subr.bf16.mxu1 %v1333_v1 }
 0x1e9   : > { %1059 = vmatpush3.bf16.msra.mxu1 %v489_v7 }
 0x1ea   : > { %1060 = vmatprep.subr.bf16.mxu1 %v1333_v1 }
 0x1ed   : > { %1061 = vmatpush3.bf16.msra.mxu1 %v490_v10 }
 0x1ee   : > { %1062 = vmatprep.subr.bf16.mxu1 %v1333_v1 }
 0x1f1   : > { %1063 = vmatpush3.bf16.msra.mxu1 %v491_v13 }
 0x1f2   : > { %1081 = vmatprep.subr.bf16.mxu1 %v1335_v31 }
 0x2a7   : > { %v605_v15 = vpop.f32.mrb[0].mxu1 }
 0x2a8   : > { %v606_v16 = vadd.f32 %v986_v14, %v605_v15  ;;  %v1046_v17 = vpop.f32.mrb[1].mxu1 }
 0x2a9   : > { %v608_v18 = vpop.f32.mrb[2].mxu1 }
 0x2aa   : > { %v612_v19 = vmax.f32 %v606_v16, 0.0  ;;  %v609_v20 = vadd.f32 %v986_v14, %v608_v18  ;;  %v1047_v21 = vpop.f32.mrb[3].mxu1 }
 0x2ac   : > { %v613_v22 = vmax.f32 %v609_v20, 0.0  ;;  %v614_v23 = vmul.f32 %v612_v19, %v1615_v32  ;;  %v988_v32 = vld [vmem:[%s1723_s8] ss:$0 sm:$0xff] }
 0x2ae   : > { %v615_v24 = vmul.f32 %v613_v22, %v1621_v35 }
 0x2b0   : > { %v616_v25 = vpack.c.bf16 %v615_v24, %v614_v23 }
 0x2b2   : > { %1065 = vmatmul.mubr.bf16.vlgmr.msra.gmra.mrb[4].mxu1 %v616_v25 }
 0x2b3   : > { %1078 = vmatprep.mubr.msk.f32.mxu1 %vm1334_vm0, %v1333_v1 }
 0x385   : > { %v651_v26 = vpop.f32.mrb[4].mxu1 }
 0x386   : > { %v1066_v27 = vpop.f32.mrb[5].mxu1 }
 0x387   : > { %v654_v28 = vpop.f32.mrb[6].mxu1 }
 0x388   : > { %v658_v29 = vpack.c.bf16 %v654_v28, %v651_v26  ;;  %v1067_v30 = vpop.f32.mrb[7].mxu1 }
 0x38a   : > { %1069 = vmatpush3.bf16.msra.mxu0 %v658_v29 }
 0x38d   : > { %1071 = vmatmul.mubr.msk.bf16.vlgmr.msra.gmra.mrb[4].mxu0 %vm493_vm1, %v506_v55 }
 0x460   : > { %v699_v35 = vpop.f32.mrb[4].mxu0 }
 0x461   : > { %v700_v36 = vadd.f32 %v988_v32, %v699_v35  ;;  %v1072_v37 = vpop.f32.mrb[5].mxu0 }
 0x462   : > { %v702_v38 = vpop.f32.mrb[6].mxu0 }
 0x463   : > { %v703_v1 = vadd.f32 %v988_v32, %v702_v38  ;;  %v1073_v39 = vpop.f32.mrb[7].mxu0  ;;  %v706_v40 = vmax.f32 %v700_v36, 0.0 }
 0x465   : > { %v707_v41 = vmax.f32 %v703_v1, 0.0 }
 0x467   : > { %v1082_v42 = vpack.c.bf16 %v707_v41, %v706_v40 }
 0x469   : > { %1083 = vmatpush3.bf16.msra.mxu1 %v1082_v42 }
 0x46c   : > { %1079 = vmatmul.mubr.msk.f32.vlgmr.msra.gmra.mrb[8].mxu1 %vm493_vm1, %v440_v43 }
 0x53f   : > { %v777_v47 = vpop.f32.mrb[8].mxu1 }
 0x540   : > { %v784_v48 = vrot.slane %v777_v47, %v783_v46  ;;  %v1080_v49 = vpop.f32.mrb[9].mxu1 }
 0x542   : > { %v786_v50 = vmul.f32 %v784_v48, %v1619_v34  ;;  %v785_v51 = vmul.f32 %v784_v48, %v1617_v33 }
 0x544   : > { %789 = vadd.xlane.f32.xlu1 %v786_v50  ;;  %787 = vadd.xlane.f32.xlu0 %v785_v51 }
 0x5d1   : > { %v790_v52 = vpop.xlane.xlu1 %789  ;;  %v788_v53 = vpop.xlane.xlu0 %787 }
 0x5d2   : > { %v791_v54 = vmax.f32 %v788_v53, %v790_v52 }
 0x5d4   : > { %v792_v55 = vrot.slane %v791_v54, 4 }
 0x5d6   : > { %v793_v56 = vmax.f32 %v791_v54, %v792_v55 }
 0x5d8   : > { %v794_v57 = vrot.slane %v793_v56, 2 }
 0x5da   : > { %v795_v58 = vmax.f32 %v793_v56, %v794_v57 }
 0x5dc   : > { %v796_v59 = vrot.slane %v795_v58, 1 }
 0x5de   : > { %v797_v60 = vmax.f32 %v795_v58, %v796_v59 }
 0x5e0   : > { %v798_v61 = vsub.f32 %v788_v53, %v797_v60  ;;  %v799_v62 = vsub.f32 %v790_v52, %v797_v60 }
 0x5e2   : > { %v800_v63 = vmul.f32 1.442695, %v798_v61  ;;  %v802_v0 = vmul.f32 1.442695, %v799_v62 }
 0x5e4   : > { %1163 = vpow2.f32 %v800_v63 }
 0x5e5   : > { %1165 = vpow2.f32 %v802_v0 }
 0x5ee   : > { %v1164_v4 = vpop.eup %1163 }
 0x5ef   : > { %v1166_v5 = vpop.eup %1165  ;;  %v804_v6 = vmul.f32 %v1164_v4, %v441_v2 }
 0x5f0   : > { %v805_v7 = vmul.f32 %v1166_v5, %v442_v3 }
 0x5f1   : > { %v807_v8 = vsel %vm806_vm2, %v804_v6, 0.0 }
 0x5f2   : > { %v808_v9 = vsel %vm806_vm2, %v805_v7, 0.0 }
 0x5f3   : > { %v809_v10 = vadd.f32 %v808_v9, %v807_v8 }
 0x5f5   : > { %v810_v11 = vrot.slane %v809_v10, 4 }
 0x5f7   : > { %v811_v12 = vadd.f32 %v810_v11, %v809_v10 }
 0x5f9   : > { %v812_v13 = vrot.slane %v811_v12, 2 }
 0x5fb   : > { %v813_v14 = vadd.f32 %v812_v13, %v811_v12 }
 0x5fd   : > { %v814_v15 = vrot.slane %v813_v14, 1 }
 0x5ff   : > { %v815_v16 = vadd.f32 %v814_v15, %v813_v14 }
 0x601   : > { %1167 = vrcp.f32 %v815_v16 }
 0x60b   : > { %v1168_v17 = vpop.eup %1167 }
 0x60c   : > { %v817_v18 = vmul.f32 %v1168_v17, %v804_v6  ;;  %v818_v19 = vmul.f32 %v1168_v17, %v805_v7 }
 0x60e   : > { %821 = vperm.xlu1 %1158, %v817_v18  }
 0x612   : > { %826 = vperm.xlu1 %1158, %v818_v19  }
 0x68d   : > { %v822_v20 = vpop.permute.xlu1 %821 }
 0x68e   : > { %v829_v22 = vmul.f32 %v822_v20, %v1617_v33 }
 0x691   : > { %v827_v21 = vpop.permute.xlu1 %826 }
 0x692   : > { %v830_v23 = vmul.f32 %v827_v21, %v1619_v34 }
 0x694   : > { %v831_v24 = vadd.f32 %v830_v23, %v829_v22 }
 0x696   : > { %v832_v25 = vrot.slane %v831_v24, 4 }
 0x698   : > { %v833_v26 = vadd.f32 %v832_v25, %v831_v24 }
 0x69a   : > { %v834_v27 = vrot.slane %v833_v26, 2 }
 0x69c   : > { %v835_v28 = vadd.f32 %v834_v27, %v833_v26 }
 0x69e   : > { %v836_v29 = vrot.slane %v835_v28, 1 }
 0x6a0   : > { %v837_v30 = vadd.f32 %v836_v29, %v835_v28 }
 0x6a2   : > { %838 = vst [vmem:[%s419_s14] sm:$0x1] %v837_v30 }
 0x6a3   : > { %1268 = shalt.err (!%p1265_p13)
}
 0x6a4   : > { %s1269_s23 = scalar_lea.hbm %s1671_s15, 16  ;;  %s1273_s21 = scalar_lea.hbm %s1724_s9, 32 }
 0x6a5   : > { %p1270_p6 = scmp.ne.s32.totalorder %s1671_s15, %s1269_s23  ;;  %p1274_p5 = scmp.lt.u32.totalorder %s1671_s15, %s1724_s9 }
 0x6a6   : > { %p1275_p8 = scmp.lt.u32.totalorder %s1273_s21, %s1269_s23  ;;  %p1277_p0 = scmp.lt.u32.totalorder %s1269_s23, %s1671_s15 }
 0x6a7   : > { %p1271_p10 = pnand %p1270_p6, %p1744_p2 }
 0x6a8   : > { %p1276_p11 = por %p1275_p8, %p1274_p5 }
 0x6a9   : > { %p1272_p4 = pneg %p1271_p10 }
 0x6aa   : > { %p1278_p3 = por %p1277_p0, %p1276_p11 }
 0x6ac   : > { %p1279_p7 = pnand %p1278_p3, %p1272_p4 }
 0x6ae   : > { %1282 = shalt.err (!%p1279_p7)
}
 0x6af   : > { %1094 = dma.vmem_to_hbm [thread:$0]  (%p1744_p2), %s1673_s28, 16, %s1671_s15, %s840_s18  }
 0x6b0 PF: > { %s1745_s22 = sld [smem:[#allocation12_spill]]  ;;  %s864_s16 = sand.u32 1, %s1313_s30  }
 0x6b1   : > { %p1747_p12 = scmp.ge.s32.totalorder %s1325_s12, 2  ;;  %s865_s13 = scalar_lea.sflag [#allocation4], %s864_s16 }
 0x6b6   : > { %p1746_p9 = scmp.ne.s32.totalorder %s1745_s22, 0 }
 0x6b8   : > { %p1108_p1 = pnand %p1747_p12, %p1746_p9 }
 0x6ba   : > { %1308 = dma.done.wait (!%p1108_p1), %s865_s13, 16  }
 0x6bb   : > { %1310 = vsyncadd (!%p1108_p1), %s865_s13, 4294967280  ;;  %p23_p13 = scmp.ge.s32.totalorder %s1503_s20, 4   ;;  %s1748_s30 = smov %s1317_s10 }
 0x6bc   : > { %s1749_s10 = smov %s1321_s11  ;;  %s1750_s11 = smov %s1519_s27 }
 0x6bd   : > { %s1751_s12 = smov %s1503_s20  ;;  %25 = sbr.rel (!%p23_p13) target bundleno = 6 (0x6), region = 118 }
 0x6c4   :  { %869 = vsyncpa [#allocation3], 1 }
 0x6c5   :  { %871 = vsyncpa [#allocation3 + $0x1], 1 }
 0x6c6   :  { %872 = vsyncpa [#allocation6], 1 }
 0x6c7   :  { %873 = vsyncpa [#allocation4], 1 }
 0x6c8   :  { %875 = vsyncpa [#allocation4 + $0x1], 1 }

</bundles_post_ra>
